<compile_context>
chip_gen: v5e
topology: v5e:2x2
jax: 0.10.0
libtpu: 0.0.40
codegen_flags: <defaults>
</compile_context>

<pallas_src>
import math

import jax
import jax.numpy as jnp
from jax.experimental import pallas as pl
from jax.experimental.pallas import tpu as pltpu

# Full f32 matmul precision so the Pallas kernel and the pure-JAX reference
# agree tightly (TPU default matmul precision truncates to bf16).
jax.config.update("jax_default_matmul_precision", "highest")

# ---------------------------------------------------------------------------
# Model / problem sizes (small, consistent with Parser.forward semantics)
# ---------------------------------------------------------------------------
B = 2             # batch size
L = 8             # sentence length (number of BERT token embeddings)
H = 32            # BERT hidden size
MAX_SEQ = 6       # config.max_seq / actions.size(1)
N_TRANS = 8       # config.n_trans
N_RELS = 12       # config.n_rels
NEG_SLOPE = 0.01  # nn.LeakyReLU default

R = B * MAX_SEQ   # 12: all (batch, step) rows processed in one shot
BL = B * L        # 16: flattened embedding rows
NSLOT = 5         # 3 arc feature slots + 2 rel feature slots
NCOLS = NSLOT * BL    # 80: one-hot gather columns
KG = NSLOT * H        # 160: lane-concatenated gathered width
LANES = 128           # lane-dense width for packed weights / output

# packed weight-slab row offsets (all multiples of 8 -> tile-aligned slices)
W1_ROWS = KG                    # rows   0:160  layer-1 weights (both heads)
B1_ROW = W1_ROWS                # row  160      layer-1 bias
W2_START = W1_ROWS + 8          # rows 168:296  layer-2 weights (both heads)
B2_ROW = W2_START + LANES       # row  296      layer-2 bias (-1000 folded in)
SLAB_ROWS = B2_ROW + 8          # 304


# ---------------------------------------------------------------------------
# Kernel: single invocation, all (batch, step) rows batched, 3 MXU matmuls.
# ---------------------------------------------------------------------------
def parser_kernel(idx_ref, bde_ref, w_ref, out_ref):
    # Build the (R, NCOLS) one-hot gather matrix on the VPU. Slot j's index
    # already carries the j*BL column offset (done on the host), so the 5
    # hits per row live in disjoint column bands and never collide.
    idx = idx_ref[...]                                            # (R, NSLOT) i32
    iota = jax.lax.broadcasted_iota(jnp.int32, (R, NCOLS), 1)
    hit = iota == idx[:, 0:1]
    for j in range(1, NSLOT):
        hit = hit | (iota == idx[:, j:j + 1])
    onehot = hit.astype(jnp.float32)

    # MXU gather: lane block j of g is embs[b, feat_j] for each row.
    g = jnp.dot(onehot, bde_ref[...], preferred_element_type=jnp.float32)   # (R, KG)

    # Fused layer-1 of both classifiers (arc hidden in lanes 0:H, rel in H:2H).
    h = jnp.dot(g, w_ref[0:W1_ROWS, :], preferred_element_type=jnp.float32)
    h = h + w_ref[B1_ROW:B1_ROW + 1, :]
    h = jnp.maximum(h, NEG_SLOPE * h)                             # LeakyReLU

    # Fused layer-2 of both classifiers; the -1000 rel adjustment and the
    # zero padding of lanes 20:128 are baked into the packed weights/bias.
    out = jnp.dot(h, w_ref[W2_START:W2_START + LANES, :],
                  preferred_element_type=jnp.float32)
    out = out + w_ref[B2_ROW:B2_ROW + 1, :]

    # Single lane-dense writeback of all steps / both heads.
    out_ref[...] = out.astype(out_ref.dtype)


# ---------------------------------------------------------------------------
# Host-side packing (plain JAX layout plumbing)
# ---------------------------------------------------------------------------
def _pack_weight_slab(params):
    (w1, b1, w2, b2, wr1, br1, wr2, br2) = params
    slab = jnp.zeros((SLAB_ROWS, LANES), jnp.float32)
    # layer-1 weights: arc (3H x H) -> lanes 0:H, rel (2H x H) -> lanes H:2H
    slab = slab.at[0:3 * H, 0:H].set(w1)
    slab = slab.at[3 * H:5 * H, H:2 * H].set(wr1)
    slab = slab.at[B1_ROW, 0:H].set(b1[0])
    slab = slab.at[B1_ROW, H:2 * H].set(br1[0])
    # layer-2 weights: arc (H x N_TRANS) -> lanes 0:8, rel (H x N_RELS) -> 8:20
    slab = slab.at[W2_START:W2_START + H, 0:N_TRANS].set(w2)
    slab = slab.at[W2_START + H:W2_START + 2 * H,
                   N_TRANS:N_TRANS + N_RELS].set(wr2)
    slab = slab.at[B2_ROW, 0:N_TRANS].set(b2[0])
    br2_adj = br2.at[0, 0:2].add(-1000.0)     # fold out_rel[:, 0:2] -= 1000
    slab = slab.at[B2_ROW, N_TRANS:N_TRANS + N_RELS].set(br2_adj[0])
    return slab


def _pack_gather_inputs(embs, feats, feats_label):
    # Row order r = b*MAX_SEQ + s so outputs reshape to (B, MAX_SEQ, n) for free.
    f = jnp.transpose(feats, (1, 0, 2)).reshape(R, 3)
    fl = jnp.transpose(feats_label, (1, 0, 2)).reshape(R, 2)
    f = jnp.clip(f, 0, L - 1)            # guard: gather indices bounded host-side
    fl = jnp.clip(fl, 0, L - 1)
    b_of_row = jnp.repeat(jnp.arange(B), MAX_SEQ)[:, None]        # (R, 1)
    arc_cols = f + b_of_row * L + jnp.arange(3)[None, :] * BL     # slot j band
    rel_cols = fl + b_of_row * L + (3 + jnp.arange(2))[None, :] * BL
    idx = jnp.concatenate([arc_cols, rel_cols], axis=1).astype(jnp.int32)  # (R, 5)

    # Block-diagonal embedding slab (NSLOT copies of the (B*L, H) embeddings
    # on the diagonal) so the one-hot matmul lands slot j in lane block
    # j*H:(j+1)*H -> one matmul does gather + lane concat for both heads.
    # TODO(synk): at real BERT sizes keep embs in HBM (memory_space=pl.ANY)
    # and DMA only the gathered rows instead of replicating NSLOT times.
    e_flat = embs.reshape(BL, H).astype(jnp.float32)
    bde = jnp.zeros((NCOLS, KG), jnp.float32)
    for j in range(NSLOT):
        bde = bde.at[j * BL:(j + 1) * BL, j * H:(j + 1) * H].set(e_flat)
    return idx, bde


def parser_forward_pallas(embs, feats, feats_label, params):
    """Teacher-forced Parser.forward hot path.

    embs:        (B, L, H) f32   -- stand-in for self.bert(...)[0]
    feats:       (MAX_SEQ, B, 3) int32
    feats_label: (MAX_SEQ, B, 2) int32
    Returns (output_acts, output_rels) with PyTorch layout
    (B, MAX_SEQ, N_TRANS), (B, MAX_SEQ, N_RELS).
    """
    idx, bde = _pack_gather_inputs(embs, feats, feats_label)
    wslab = _pack_weight_slab(params)

    out = pl.pallas_call(
        parser_kernel,
        out_shape=jax.ShapeDtypeStruct((R, LANES), jnp.float32),
        in_specs=[
            pl.BlockSpec(memory_space=pltpu.MemorySpace.VMEM),   # idx   (R, 5) i32
            pl.BlockSpec(memory_space=pltpu.MemorySpace.VMEM),   # bde   (80, 160)
            pl.BlockSpec(memory_space=pltpu.MemorySpace.VMEM),   # wslab (304, 128)
        ],
        out_specs=pl.BlockSpec(memory_space=pltpu.MemorySpace.VMEM),
    )(idx, bde, wslab)

    # Free layout plumbing back to the PyTorch (B, max_seq, n) layout.
    acts = out[:, 0:N_TRANS].reshape(B, MAX_SEQ, N_TRANS)
    rels = out[:, N_TRANS:N_TRANS + N_RELS].reshape(B, MAX_SEQ, N_RELS)
    return acts, rels


# ---------------------------------------------------------------------------
# Deterministic parameter init (mirrors Classifier.__init__)
# ---------------------------------------------------------------------------
def xavier_uniform(key, fan_out, fan_in):
    bound = math.sqrt(6.0 / (fan_in + fan_out))
    # PyTorch weight shape is (out, in); return the (in, out) transpose used
    # by the kernel (y = x @ W.T + b  ==  x @ Wt + b).
    w = jax.random.uniform(key, (fan_out, fan_in), jnp.float32, -bound, bound)
    return w.T


def linear_bias(key, fan_in, fan_out):
    bound = 1.0 / math.sqrt(fan_in)
    return jax.random.uniform(key, (1, fan_out), jnp.float32, -bound, bound)


def init_params(key):
    ks = jax.random.split(key, 8)
    # Classifier(3*H, H, N_TRANS)
    w1 = xavier_uniform(ks[0], H, 3 * H)          # (3H, H)
    b1 = linear_bias(ks[1], 3 * H, H)             # (1, H)
    w2 = xavier_uniform(ks[2], N_TRANS, H)        # (H, N_TRANS)
    b2 = linear_bias(ks[3], H, N_TRANS)           # (1, N_TRANS)
    # Classifier(2*H, H, N_RELS)
    wr1 = xavier_uniform(ks[4], H, 2 * H)         # (2H, H)
    br1 = linear_bias(ks[5], 2 * H, H)            # (1, H)
    wr2 = xavier_uniform(ks[6], N_RELS, H)        # (H, N_RELS)
    br2 = linear_bias(ks[7], H, N_RELS)           # (1, N_RELS)
    return (w1, b1, w2, b2, wr1, br1, wr2, br2)


# ---------------------------------------------------------------------------
# Pure-JAX reference for correctness check
# ---------------------------------------------------------------------------
def reference_forward(embs, feats, feats_label, params):
    (w1, b1, w2, b2, wr1, br1, wr2, br2) = params
    hp = jax.lax.Precision.HIGHEST
    acts, rels = [], []
    for s in range(MAX_SEQ):
        idx = feats[s]                                            # (B, 3)
        gat = embs[jnp.arange(B)[:, None], idx].reshape(B, -1)    # (B, 3H)
        h = jnp.dot(gat, w1, precision=hp) + b1
        h = jnp.where(h > 0, h, NEG_SLOPE * h)
        out_arc = jnp.dot(h, w2, precision=hp) + b2

        idxl = feats_label[s]                                     # (B, 2)
        gatl = embs[jnp.arange(B)[:, None], idxl].reshape(B, -1)  # (B, 2H)
        hr = jnp.dot(gatl, wr1, precision=hp) + br1
        hr = jnp.where(hr > 0, hr, NEG_SLOPE * hr)
        out_rel = jnp.dot(hr, wr2, precision=hp) + br2
        out_rel = out_rel.at[:, 0:2].add(-1000.0)

        acts.append(out_arc)
        rels.append(out_rel)
    return jnp.stack(acts, axis=1), jnp.stack(rels, axis=1)


# ---------------------------------------------------------------------------
if __name__ == "__main__":
    key = jax.random.PRNGKey(0)
    k_emb, k_par = jax.random.split(key)

    # Stand-in for BERT embeddings: self.bert(words, tags, mask)[0]
    embs = jax.random.normal(k_emb, (B, L, H), jnp.float32)

    # Deterministic stand-ins for merge(states) / merge_label(states):
    # per-step stack/buffer token indices into the sentence of length L.
    steps = jnp.arange(MAX_SEQ)[:, None, None]
    batch = jnp.arange(B)[None, :, None]
    feats = ((steps + batch + jnp.arange(3)[None, None, :]) % L).astype(jnp.int32)
    feats_label = ((steps + 2 * batch + jnp.arange(2)[None, None, :]) % L).astype(jnp.int32)

    params = init_params(k_par)

    output_acts, output_rels = parser_forward_pallas(embs, feats, feats_label, params)
    jax.block_until_ready((output_acts, output_rels))

    ref_acts, ref_rels = reference_forward(embs, feats, feats_label, params)
    assert output_acts.shape == (B, MAX_SEQ, N_TRANS)
    assert output_rels.shape == (B, MAX_SEQ, N_RELS)
    assert jnp.allclose(output_acts, ref_acts, atol=5e-3, rtol=1e-3)
    assert jnp.allclose(output_rels, ref_rels, atol=5e-3, rtol=1e-3)

    print("KERNEL_OK")
</pallas_src>

<mosaic_0001>
module attributes {stable_mosaic.version = 11 : i64} {
  func.func @parser_kernel(%arg0: memref<12x5xi32, #tpu.memory_space<vmem>>, %arg1: memref<80x160xf32, #tpu.memory_space<vmem>>, %arg2: memref<304x128xf32, #tpu.memory_space<vmem>>, %arg3: memref<12x128xf32, #tpu.memory_space<vmem>>) attributes {dimension_semantics = [], scalar_prefetch = 0 : i64, scratch_operands = 0 : i64, tpu.core_type = #tpu.core_type<tc>} {
    %c0 = arith.constant 0 : index
    %c0_0 = arith.constant 0 : index
    %0 = vector.load %arg0[%c0, %c0_0] : memref<12x5xi32, #tpu.memory_space<vmem>>, vector<12x5xi32>
    %1 = tpu.iota {dimensions = array<i32: 1>} : vector<12x80xi32>
    %2 = vector.extract_strided_slice %0 {offsets = [0, 0], sizes = [12, 1], strides = [1, 1]} : vector<12x5xi32> to vector<12x1xi32>
    %3 = vector.broadcast %2 : vector<12x1xi32> to vector<12x80xi32>
    %4 = arith.cmpi eq, %1, %3 : vector<12x80xi32>
    %5 = vector.extract_strided_slice %0 {offsets = [0, 1], sizes = [12, 1], strides = [1, 1]} : vector<12x5xi32> to vector<12x1xi32>
    %6 = vector.broadcast %5 : vector<12x1xi32> to vector<12x80xi32>
    %7 = arith.cmpi eq, %1, %6 : vector<12x80xi32>
    %8 = arith.ori %4, %7 : vector<12x80xi1>
    %9 = vector.extract_strided_slice %0 {offsets = [0, 2], sizes = [12, 1], strides = [1, 1]} : vector<12x5xi32> to vector<12x1xi32>
    %10 = vector.broadcast %9 : vector<12x1xi32> to vector<12x80xi32>
    %11 = arith.cmpi eq, %1, %10 : vector<12x80xi32>
    %12 = arith.ori %8, %11 : vector<12x80xi1>
    %13 = vector.extract_strided_slice %0 {offsets = [0, 3], sizes = [12, 1], strides = [1, 1]} : vector<12x5xi32> to vector<12x1xi32>
    %14 = vector.broadcast %13 : vector<12x1xi32> to vector<12x80xi32>
    %15 = arith.cmpi eq, %1, %14 : vector<12x80xi32>
    %16 = arith.ori %12, %15 : vector<12x80xi1>
    %17 = vector.extract_strided_slice %0 {offsets = [0, 4], sizes = [12, 1], strides = [1, 1]} : vector<12x5xi32> to vector<12x1xi32>
    %18 = vector.broadcast %17 : vector<12x1xi32> to vector<12x80xi32>
    %19 = arith.cmpi eq, %1, %18 : vector<12x80xi32>
    %20 = arith.ori %16, %19 : vector<12x80xi1>
    %21 = arith.extui %20 : vector<12x80xi1> to vector<12x80xi32>
    %22 = arith.sitofp %21 : vector<12x80xi32> to vector<12x80xf32>
    %c0_1 = arith.constant 0 : index
    %c0_2 = arith.constant 0 : index
    %23 = vector.load %arg1[%c0_1, %c0_2] : memref<80x160xf32, #tpu.memory_space<vmem>>, vector<80x160xf32>
    %cst = arith.constant dense<0.000000e+00> : vector<12x160xf32>
    %24 = tpu.matmul %22, %23, %cst {dimension_numbers = #tpu.dot_dimension_numbers<[1], [0], [0], [1], [0, 0, 1, 1], [], []>, precision = #tpu.contract_precision<fp32>} : vector<12x80xf32>, vector<80x160xf32>, vector<12x160xf32> -> vector<12x160xf32>
    %c0_3 = arith.constant 0 : index
    %c0_4 = arith.constant 0 : index
    %25 = vector.load %arg2[%c0_3, %c0_4] : memref<304x128xf32, #tpu.memory_space<vmem>>, vector<160x128xf32>
    %cst_5 = arith.constant dense<0.000000e+00> : vector<12x128xf32>
    %26 = tpu.matmul %24, %25, %cst_5 {dimension_numbers = #tpu.dot_dimension_numbers<[1], [0], [0], [1], [0, 0, 1, 1], [], []>, precision = #tpu.contract_precision<fp32>} : vector<12x160xf32>, vector<160x128xf32>, vector<12x128xf32> -> vector<12x128xf32>
    %c160 = arith.constant 160 : index
    %c0_6 = arith.constant 0 : index
    %27 = vector.load %arg2[%c160, %c0_6] : memref<304x128xf32, #tpu.memory_space<vmem>>, vector<1x128xf32>
    %28 = vector.broadcast %27 : vector<1x128xf32> to vector<12x128xf32>
    %29 = arith.addf %26, %28 : vector<12x128xf32>
    %cst_7 = arith.constant 0.00999999977 : f32
    %30 = vector.broadcast %cst_7 : f32 to vector<12x128xf32>
    %31 = arith.mulf %30, %29 : vector<12x128xf32>
    %32 = arith.maximumf %29, %31 : vector<12x128xf32>
    %c168 = arith.constant 168 : index
    %c0_8 = arith.constant 0 : index
    %33 = vector.load %arg2[%c168, %c0_8] : memref<304x128xf32, #tpu.memory_space<vmem>>, vector<128x128xf32>
    %cst_9 = arith.constant dense<0.000000e+00> : vector<12x128xf32>
    %34 = tpu.matmul %32, %33, %cst_9 {dimension_numbers = #tpu.dot_dimension_numbers<[1], [0], [0], [1], [0, 0, 1, 1], [], []>, precision = #tpu.contract_precision<fp32>} : vector<12x128xf32>, vector<128x128xf32>, vector<12x128xf32> -> vector<12x128xf32>
    %c296 = arith.constant 296 : index
    %c0_10 = arith.constant 0 : index
    %35 = vector.load %arg2[%c296, %c0_10] : memref<304x128xf32, #tpu.memory_space<vmem>>, vector<1x128xf32>
    %36 = vector.broadcast %35 : vector<1x128xf32> to vector<12x128xf32>
    %37 = arith.addf %34, %36 : vector<12x128xf32>
    %c0_11 = arith.constant 0 : index
    %c0_12 = arith.constant 0 : index
    %38 = vector.load %arg3[%c0_11, %c0_12] : memref<12x128xf32, #tpu.memory_space<vmem>>, vector<12x128xf32>
    tpu.vector_store %arg3[%c0_11, %c0_12], %37 {strides = array<i32>} : memref<12x128xf32, #tpu.memory_space<vmem>>, vector<12x128xf32>,
    return
  }
}

</mosaic_0001>

<bundles_post_ra>
// kernel: tpu_custom_call.1
= control target key start
LH: loop header
LB: loop body
LE: loop exit
PB: predicated region body
PF: predicated region fallthrough
CT: control target
= control target key end

     0   :  { %8 = vsyncpa [#allocation3], 0  ;;  %s2801_s0 = inlined_call_operand.vmem [shape: s32[12,5], index: 0, kind: input, shape index: {}]   ;;  %s2802_s1 = inlined_call_operand.hbm [shape: f32[80,160], index: 1, kind: input, shape index: {}]   ;;  %s2803_s2 = inlined_call_operand.hbm [shape: f32[304,128], index: 2, kind: input, shape index: {}]   ;;  %s2804_s3 = inlined_call_operand.hbm [shape: f32[12,128], index: 3, kind: output, shape index: {}]  }
   0x1   :  { %9 = vsyncpa [#allocation6], 0 }
   0x2   :  { %10 = vsyncpa [#allocation4], 0  ;;  %s17_s14 = sshll.u32 %s2802_s1, 4  ;;  %s1877_s15 = smov [#allocation2]   ;;  %s18_s14 = int_to_ptr.hbm [resolvable:$true] %s17_s14 }
   0x3   :  { %s19_s16 = sshll.u32 %s1877_s15, 4  ;;  %s30_s19 = sshll.u32 %s2803_s2, 4  ;;  %s20_s16 = int_to_ptr.vmem [resolvable:$true] %s19_s16  ;;  %s31_s19 = int_to_ptr.hbm [resolvable:$true] %s30_s19 }
   0x4   :  { %s1878_s20 = smov 256   ;;  %s1879_s21 = smov 16  }
   0x5   :  { %25 = dma.hbm_to_vmem [thread:$0]  %s18_s14, 2560, %s20_s16, [#allocation3], %s1878_s20, %s1878_s20, %s1879_s21  }
   0x6   :  { %s1880_s22 = smov [#allocation5]   ;;  %s1881_s24 = smov 128  }
   0x7   :  { %s32_s23 = sshll.u32 %s1880_s22, 4  ;;  %s1882_s25 = smov 8   ;;  %s33_s23 = int_to_ptr.vmem [resolvable:$true] %s32_s23 }
   0x8   :  { %38 = dma.hbm_to_vmem [thread:$0]  %s31_s19, 4864, %s33_s23, [#allocation6], %s1881_s24, %s1881_s24, %s1882_s25  }
   0x9   :  { %1871 = dma.done.wait [#allocation3], 2560  }
   0xa   :  { %1872 = vsyncadd [#allocation3], 4294964736 }
   0xb   :  { %1873 = dma.done.wait [#allocation6], 4864  }
   0xc   :  { %1874 = vsyncadd [#allocation6], 4294962432  ;;  %v1883_v0 = vmov 2   ;;  %v1884_v1 = vmov 0   ;;  %v1885_v2 = vmov 4   ;;  %v47_v3 = vld [vmem:[%s2801_s0] sm:$0xff] }
   0xd   :  { %1788 = vset.pattern.permute.xlu1 %v1883_v0  ;;  %1786 = vset.pattern.permute.xlu0 %v1884_v1  ;;  %v121_v4 = vld [vmem:[#allocation2 + $0x90] sm:$0xff]  ;;  %v119_v6 = vld [vmem:[#allocation2 + $0x80] sm:$0xff]  ;;  %v1886_v14 = vmov 3   ;;  %v1887_v15 = vmov 1   ;;  %v48_v18 = vld [vmem:[%s2801_s0 + $0x8] sm:$0xf] }
   0xe   :  { %1790 = vset.pattern.permute.xlu2 %v1885_v2  ;;  %70 = vperm.xlu1 %1788, %v47_v3   ;;  %v1922_v5 = vand.u32 4294901760, %v121_v4  ;;  %v1924_v7 = vand.u32 4294901760, %v119_v6  ;;  %v117_v19 = vld [vmem:[#allocation2 + $0x70] sm:$0xff]  ;;  %v115_v21 = vld [vmem:[#allocation2 + $0x60] sm:$0xff]  ;;  %vm123_vm8 = vcmask 654336   ;;  %s1889_s0 = smov [#allocation7]  }
   0xf   :  { %52 = vperm.xlu0 %1786, %v47_v3   ;;  %90 = vperm.xlu2 %1790, %v47_v3   ;;  %v1949_v20 = vand.u32 4294901760, %v117_v19  ;;  %v1954_v23 = vand.u32 4294901760, %v115_v21  ;;  %v113_v24 = vld [vmem:[#allocation2 + $0x50] sm:$0xff]  ;;  %v111_v28 = vld [vmem:[#allocation2 + $0x40] sm:$0xff]  ;;  %s1735_s28 = sshll.u32 %s1889_s0, 4  ;;  %s1737_s4 = sshll.u32 %s2804_s3, 4  ;;  %s1736_s28 = int_to_ptr.vmem [resolvable:$true] %s1735_s28  ;;  %s1738_s4 = int_to_ptr.hbm [resolvable:$true] %s1737_s4 }
  0x10   :  { %v1927_v8 = vsub.f32 %v121_v4, %v1922_v5  ;;  %302 = vmatpush.msra.mxu3 %v1922_v5  ;;  %137 = vmatpush.msra.mxu0 %v1922_v5  ;;  %v1932_v9 = vsub.f32 %v119_v6, %v1924_v7  ;;  %v1963_v27 = vand.u32 4294901760, %v113_v24  ;;  %v1975_v32 = vand.u32 4294901760, %v111_v28  ;;  %v109_v33 = vld [vmem:[#allocation2 + $0x30] sm:$0xff]  ;;  %v107_v39 = vld [vmem:[#allocation2 + $0x20] sm:$0xff]  ;;  %v120_v6 = vld [vmem:[#allocation2 + $0x88] sm:$0xff] }
  0x11   :  { %v1952_v22 = vsub.f32 %v117_v19, %v1949_v20  ;;  %v1960_v26 = vsub.f32 %v115_v21, %v1954_v23  ;;  %v1988_v38 = vand.u32 4294901760, %v109_v33  ;;  %v1996_v43 = vand.u32 4294901760, %v107_v39  ;;  %v105_v45 = vld [vmem:[#allocation2 + $0x10] sm:$0xff]  ;;  %v103_v51 = vld [vmem:[#allocation2] sm:$0xff] }
  0x12   :  { %v181_v10 = vand.u32 4294901760, %v1927_v8  ;;  %256 = vmatpush.msra.mxu2 %v1927_v8  ;;  %304 = vmatpush.msra.mxu3 %v1924_v7  ;;  %v187_v11 = vand.u32 4294901760, %v1932_v9  ;;  %v1972_v31 = vsub.f32 %v113_v24, %v1963_v27  ;;  %v1984_v37 = vsub.f32 %v111_v28, %v1975_v32 }
  0x13   :  { %139 = vmatpush.msra.mxu0 %v1924_v7  ;;  %v193_v25 = vand.u32 4294901760, %v1952_v22  ;;  %v199_v30 = vand.u32 4294901760, %v1960_v26  ;;  %v1999_v44 = vsub.f32 %v109_v33, %v1988_v38  ;;  %v2007_v48 = vsub.f32 %v107_v39, %v1996_v43 }
  0x14   :  { %v182_v12 = vsub.f32 %v1927_v8, %v181_v10  ;;  %259 = vmatpush.msra.mxu2 %v1932_v9  ;;  %v188_v13 = vsub.f32 %v1932_v9, %v187_v11  ;;  %306 = vmatpush.msra.mxu3 %v1949_v20  ;;  %v205_v36 = vand.u32 4294901760, %v1972_v31  ;;  %v211_v42 = vand.u32 4294901760, %v1984_v37 }
  0x15   :  { %141 = vmatpush.msra.mxu0 %v1949_v20  ;;  %v194_v29 = vsub.f32 %v1952_v22, %v193_v25  ;;  %v200_v35 = vsub.f32 %v1960_v26, %v199_v30  ;;  %v2009_v49 = vand.u32 4294901760, %v105_v45  ;;  %v217_v50 = vand.u32 4294901760, %v1999_v44 }
  0x16   :  { %1789 = vset.pattern.permute.xlu1 %v1886_v14  ;;  %v183_v16 = vand.u32 4294901760, %v182_v12  ;;  %v189_v17 = vand.u32 4294901760, %v188_v13  ;;  %262 = vmatpush.msra.mxu2 %v1952_v22  ;;  %v206_v41 = vsub.f32 %v1972_v31, %v205_v36  ;;  %v212_v47 = vsub.f32 %v1984_v37, %v211_v42 }
  0x17   :  { %1787 = vset.pattern.permute.xlu0 %v1887_v15  ;;  %80 = vperm.xlu1 %1789, %v47_v3   ;;  %v195_v34 = vand.u32 4294901760, %v194_v29  ;;  %v201_v40 = vand.u32 4294901760, %v200_v35  ;;  %v223_v53 = vand.u32 4294901760, %v2007_v48  ;;  %v2016_v54 = vsub.f32 %v105_v45, %v2009_v49 }
  0x18   :  { %60 = vperm.xlu0 %1787, %v47_v3   ;;  %1791 = vset.pattern.permute.xlu2 %v1884_v1  ;;  %v207_v46 = vand.u32 4294901760, %v206_v41  ;;  %v213_v52 = vand.u32 4294901760, %v212_v47  ;;  %v2018_v55 = vand.u32 4294901760, %v103_v51  ;;  %v218_v56 = vsub.f32 %v1999_v44, %v217_v50 }
  0x19   :  { %184 = vmatpush.msra.mxu1 %v183_v16  ;;  %55 = vperm.xlu2 %1791, %v48_v18   ;;  %v224_v57 = vsub.f32 %v2007_v48, %v223_v53  ;;  %v229_v58 = vand.u32 4294901760, %v2016_v54  ;;  %v2052_v12 = vand.u32 4294901760, %v120_v6 }
  0x1a   :  { %308 = vmatpush.msra.mxu3 %v1954_v23  ;;  %143 = vmatpush.msra.mxu0 %v1954_v23  ;;  %v2031_v59 = vsub.f32 %v103_v51, %v2018_v55  ;;  %v219_v60 = vand.u32 4294901760, %v218_v56 }
  0x1b   :  { %190 = vmatpush.msra.mxu1 %v189_v17  ;;  %265 = vmatpush.msra.mxu2 %v1960_v26  ;;  %v225_v61 = vand.u32 4294901760, %v224_v57  ;;  %v230_v62 = vsub.f32 %v2016_v54, %v229_v58  ;;  %v2064_v9 = vsub.f32 %v120_v6, %v2052_v12 }
  0x1c   :  { %310 = vmatpush.msra.mxu3 %v1963_v27  ;;  %145 = vmatpush.msra.mxu0 %v1963_v27  ;;  %v235_v63 = vand.u32 4294901760, %v2031_v59 }
  0x1d   :  { %268 = vmatpush.msra.mxu2 %v1972_v31  ;;  %196 = vmatpush.msra.mxu1 %v195_v34  ;;  %v481_v16 = vand.u32 4294901760, %v2064_v9  ;;  %v110_v31 = vld [vmem:[#allocation2 + $0x38] sm:$0xff] }
  0x1e   :  { %312 = vmatpush.msra.mxu3 %v1975_v32  ;;  %147 = vmatpush.msra.mxu0 %v1975_v32  ;;  %v236_v1 = vsub.f32 %v2031_v59, %v235_v63  ;;  %v2106_v34 = vand.u32 4294901760, %v110_v31 }
  0x1f   :  { %1792 = vset.pattern.permute.xlu1 %v1887_v15  ;;  %271 = vmatpush.msra.mxu2 %v1984_v37  ;;  %v482_v21 = vsub.f32 %v2064_v9, %v481_v16  ;;  %v108_v37 = vld [vmem:[#allocation2 + $0x28] sm:$0xff] }
  0x20   :  { %1794 = vset.pattern.permute.xlu0 %v1886_v14  ;;  %63 = vperm.xlu1 %1792, %v48_v18   ;;  %v237_v4 = vand.u32 4294901760, %v236_v1  ;;  %v118_v14 = vld [vmem:[#allocation2 + $0x78] sm:$0xff]  ;;  %v2123_v41 = vsub.f32 %v110_v31, %v2106_v34 }
  0x21   :  { %83 = vperm.xlu0 %1794, %v48_v18   ;;  %1793 = vset.pattern.permute.xlu2 %v1883_v0  ;;  %v231_v0 = vand.u32 4294901760, %v230_v62  ;;  %v483_v26 = vand.u32 4294901760, %v482_v21 }
  0x22   :  { %73 = vperm.xlu2 %1793, %v48_v18   ;;  %314 = vmatpush.msra.mxu3 %v1988_v38 }
  0x23   :  { %149 = vmatpush.msra.mxu0 %v1988_v38  ;;  %202 = vmatpush.msra.mxu1 %v201_v40  ;;  %v2120_v40 = vand.u32 4294901760, %v108_v37 }
  0x24   :  { %274 = vmatpush.msra.mxu2 %v1999_v44  ;;  %316 = vmatpush.msra.mxu3 %v1996_v43  ;;  %v106_v44 = vld [vmem:[#allocation2 + $0x18] sm:$0xff] }
  0x25   :  { %208 = vmatpush.msra.mxu1 %v207_v46  ;;  %151 = vmatpush.msra.mxu0 %v1996_v43  ;;  %v511_v46 = vand.u32 4294901760, %v2123_v41  ;;  %v2136_v47 = vand.u32 4294901760, %v106_v44 }
  0x26   :  { %277 = vmatpush.msra.mxu2 %v2007_v48  ;;  %318 = vmatpush.msra.mxu3 %v2009_v49  ;;  %v2139_v48 = vsub.f32 %v108_v37, %v2120_v40 }
  0x27   :  { %214 = vmatpush.msra.mxu1 %v213_v52  ;;  %153 = vmatpush.msra.mxu0 %v2009_v49 }
  0x28   :  { %1795 = vset.pattern.permute.xlu1 %v1885_v2  ;;  %280 = vmatpush.msra.mxu2 %v2016_v54  ;;  %v517_v56 = vand.u32 4294901760, %v2139_v48 }
  0x29   :  { %1796 = vset.pattern.permute.xlu0 %v1885_v2  ;;  %93 = vperm.xlu1 %1795, %v48_v18   ;;  %v122_v2 = vld [vmem:[#allocation2 + $0x98] sm:$0xff] }
  0x2a   :  { %320 = vmatpush.msra.mxu3 %v2018_v55  ;;  %155 = vmatpush.msra.mxu0 %v2018_v55  ;;  %v2047_v3 = vand.u32 4294901760, %v122_v2 }
  0x2b   :  { %220 = vmatpush.msra.mxu1 %v219_v60  ;;  %283 = vmatpush.msra.mxu2 %v2031_v59 }
  0x2c   :  { %343 = vmatpush.msrb.mxu0 %v181_v10  ;;  %v2055_v13 = vsub.f32 %v122_v2, %v2047_v3  ;;  %v2061_v10 = vand.u32 4294901760, %v118_v14 }
  0x2d   :  { %226 = vmatpush.msra.mxu1 %v225_v61  ;;  %431 = vmatpush.msrb.mxu2 %v2047_v3  ;;  %v518_v61 = vsub.f32 %v2139_v48, %v517_v56 }
  0x2e   :  { %347 = vmatpush.msrb.mxu0 %v187_v11  ;;  %v475_v8 = vand.u32 4294901760, %v2055_v13  ;;  %v116_v11 = vld [vmem:[#allocation2 + $0x68] sm:$0xff]  ;;  %v2077_v18 = vsub.f32 %v118_v14, %v2061_v10 }
  0x2f   :  { %232 = vmatpush.msra.mxu1 %v231_v0  ;;  %433 = vmatpush.msrb.mxu2 %v2052_v12  ;;  %v2074_v17 = vand.u32 4294901760, %v116_v11  ;;  %v519_v59 = vand.u32 4294901760, %v518_v61  ;;  %v49_v0 = vlaneseq  ;;  %v726_v61 = vld [vmem:[#allocation5 + $0x40] sm:$0xff] }
  0x30   :  { %351 = vmatpush.msrb.mxu0 %v193_v25  ;;  %v476_v15 = vsub.f32 %v2055_v13, %v475_v8  ;;  %v487_v22 = vand.u32 4294901760, %v2077_v18 }
  0x31   :  { %238 = vmatpush.msra.mxu1 %v237_v4  ;;  %435 = vmatpush.msrb.mxu2 %v2061_v10  ;;  %v2091_v25 = vsub.f32 %v116_v11, %v2074_v17  ;;  %v50_v6 = vand.u32 127, %v49_v0  ;;  %v725_v0 = vld [vmem:[#allocation5 + $0x38] sm:$0xff] }
  0x32   :  { %355 = vmatpush.msrb.mxu0 %v199_v30  ;;  %v477_v19 = vand.u32 4294901760, %v476_v15  ;;  %v488_v28 = vsub.f32 %v2077_v18, %v487_v22 }
  0x33   :  { %396 = vmatpush.msrb.mxu1 %v1922_v5  ;;  %v114_v5 = vld [vmem:[#allocation2 + $0x58] sm:$0xff]  ;;  %437 = vmatpush.msrb.mxu2 %v2074_v17 }
  0x34   :  { %359 = vmatpush.msrb.mxu0 %v205_v36  ;;  %v2088_v24 = vand.u32 4294901760, %v114_v5  ;;  %478 = vmatpush.msrb.mxu3 %v477_v19  ;;  %v489_v33 = vand.u32 4294901760, %v488_v28 }
  0x35   :  { %398 = vmatpush.msrb.mxu1 %v1924_v7  ;;  %v112_v7 = vld [vmem:[#allocation2 + $0x48] sm:$0xff] }
  0x36   :  { %363 = vmatpush.msrb.mxu0 %v211_v42  ;;  %v2098_v29 = vand.u32 4294901760, %v112_v7  ;;  %439 = vmatpush.msrb.mxu2 %v2088_v24  ;;  %v2104_v30 = vsub.f32 %v114_v5, %v2088_v24 }
  0x37   :  { %400 = vmatpush.msrb.mxu1 %v1949_v20  ;;  %v493_v20 = vand.u32 4294901760, %v2091_v25  ;;  %484 = vmatpush.msrb.mxu3 %v483_v26 }
  0x38   :  { %v2109_v35 = vsub.f32 %v112_v7, %v2098_v29  ;;  %367 = vmatpush.msrb.mxu0 %v217_v50  ;;  %441 = vmatpush.msrb.mxu2 %v2098_v29  ;;  %v499_v36 = vand.u32 4294901760, %v2104_v30  ;;  %v104_v50 = vld [vmem:[#allocation2 + $0x8] sm:$0xff] }
  0x39   :  { %402 = vmatpush.msrb.mxu1 %v1954_v23  ;;  %v494_v23 = vsub.f32 %v2091_v25, %v493_v20  ;;  %490 = vmatpush.msrb.mxu3 %v489_v33  ;;  %v2149_v57 = vand.u32 4294901760, %v104_v50 }
  0x3a   :  { %v505_v39 = vand.u32 4294901760, %v2109_v35  ;;  %371 = vmatpush.msrb.mxu0 %v223_v53  ;;  %v500_v42 = vsub.f32 %v2104_v30, %v499_v36  ;;  %443 = vmatpush.msrb.mxu2 %v2106_v34  ;;  %v512_v53 = vsub.f32 %v2123_v41, %v511_v46 }
  0x3b   :  { %404 = vmatpush.msrb.mxu1 %v1963_v27  ;;  %v495_v27 = vand.u32 4294901760, %v494_v23  ;;  %v2162_v62 = vsub.f32 %v104_v50, %v2149_v57 }
  0x3c   :  { %v506_v45 = vsub.f32 %v2109_v35, %v505_v39  ;;  %375 = vmatpush.msrb.mxu0 %v229_v58  ;;  %445 = vmatpush.msrb.mxu2 %v2120_v40  ;;  %v513_v60 = vand.u32 4294901760, %v512_v53  ;;  %v728_v53 = vld [vmem:[#allocation5 + $0x50] sm:$0xff] }
  0x3d   :  { %406 = vmatpush.msrb.mxu1 %v1975_v32  ;;  %496 = vmatpush.msrb.mxu3 %v495_v27  ;;  %v501_v32 = vand.u32 4294901760, %v500_v42 }
  0x3e   :  { %v507_v52 = vand.u32 4294901760, %v506_v45  ;;  %379 = vmatpush.msrb.mxu0 %v235_v63  ;;  %447 = vmatpush.msrb.mxu2 %v2136_v47  ;;  %v529_v63 = vand.u32 4294901760, %v2162_v62 }
  0x3f   :  { %408 = vmatpush.msrb.mxu1 %v1988_v38  ;;  %502 = vmatpush.msrb.mxu3 %v501_v32  ;;  %v2155_v38 = vsub.f32 %v106_v44, %v2136_v47 }
  0x40   :  { %449 = vmatpush.msrb.mxu2 %v2149_v57  ;;  %v530_v2 = vsub.f32 %v2162_v62, %v529_v63 }
  0x41   :  { %410 = vmatpush.msrb.mxu1 %v1996_v43  ;;  %508 = vmatpush.msrb.mxu3 %v507_v52  ;;  %v523_v43 = vand.u32 4294901760, %v2155_v38 }
  0x42   :  { %v531_v4 = vand.u32 4294901760, %v530_v2 }
  0x43   :  { %412 = vmatpush.msrb.mxu1 %v2009_v49  ;;  %514 = vmatpush.msrb.mxu3 %v513_v60  ;;  %v524_v1 = vsub.f32 %v2155_v38, %v523_v43 }
  0x45   :  { %414 = vmatpush.msrb.mxu1 %v2018_v55  ;;  %520 = vmatpush.msrb.mxu3 %v519_v59  ;;  %v525_v49 = vand.u32 4294901760, %v524_v1  ;;  %v1888_v55 = vmov 0.0  }
  0x47   :  { %526 = vmatpush.msrb.mxu3 %v525_v49 }
  0x49   :  { %532 = vmatpush.msrb.mxu3 %v531_v4 }
  0x69   :  { %v91_v51 = vpop.permute.xlu2 %90 }
  0x6a   :  { %vm95_vm6 = vcmp.eq.s32.totalorder %v50_v6, %v91_v51  ;;  %v729_v51 = vld [vmem:[#allocation5 + $0x58] sm:$0xff] }
  0x6b   :  { %v2327_v52 = vand.u32 4294901760, %v729_v51 }
  0x73   :  { %v56_v14 = vpop.permute.xlu2 %55 }
  0x74   :  { %vm58_vm11 = vcmp.eq.s32.totalorder %v50_v6, %v56_v14  ;;  %v724_v14 = vld [vmem:[#allocation5 + $0x30] sm:$0xff] }
  0x7c   :  { %v74_v26 = vpop.permute.xlu2 %73 }
  0x7d   :  { %vm76_vm13 = vcmp.eq.s32.totalorder %v50_v6, %v74_v26 }
  0x80   :  { %v71_v54 = vpop.permute.xlu1 %70 }
  0x81   :  { %v53_v58 = vpop.permute.xlu0 %52  ;;  %vm75_vm2 = vcmp.eq.s32.totalorder %v50_v6, %v71_v54 }
  0x82   :  { %vm57_vm0 = vcmp.eq.s32.totalorder %v50_v6, %v53_v58 }
  0x89   :  { %v81_v11 = vpop.permute.xlu1 %80 }
  0x8a   :  { %v61_v15 = vpop.permute.xlu0 %60  ;;  %vm85_vm4 = vcmp.eq.s32.totalorder %v50_v6, %v81_v11 }
  0x8b   :  { %vm65_vm1 = vcmp.eq.s32.totalorder %v50_v6, %v61_v15 }
  0x8c   :  { %vm67_vm3 = vmor %vm57_vm0, %vm65_vm1 }
  0x8d   :  { %vm77_vm5 = vmor %vm67_vm3, %vm75_vm2  ;;  %vm740_vm3 = vcmask 261120  }
  0x8e   :  { %vm87_vm7 = vmor %vm77_vm5, %vm85_vm4 }
  0x8f   :  { %vm97_vm9 = vmor %vm87_vm7, %vm95_vm6 }
  0x90   :  { %v2175_v5 = vsel %vm97_vm9, 1.0, %v1888_v55 }
  0x91   :  { %1753 = vmatmul.msk.f32.vlgmr.msra.gmra.mxu1 %vm123_vm8, %v2175_v5  ;;  %v125_v19 = vsel %vm123_vm8, %v2175_v5, 0 }
  0x92   :  { %v2181_v21 = vsub.f32 %v125_v19, %v125_v19  ;;  %596 = vmatpush.msra.mxu1 %v2047_v3  ;;  %v64_v7 = vpop.permute.xlu1 %63 }
  0x93   :  { %vm66_vm10 = vcmp.eq.s32.totalorder %v50_v6, %v64_v7  ;;  %v84_v33 = vpop.permute.xlu0 %83 }
  0x94   :  { %286 = vmatmul.f32.vlgmr.msra.gmra.mxu2 %v2181_v21  ;;  %v2186_v28 = vand.u32 4294901760, %v2181_v21  ;;  %598 = vmatpush.msra.mxu1 %v2052_v12  ;;  %vm68_vm12 = vmor %vm58_vm11, %vm66_vm10  ;;  %vm86_vm15 = vcmp.eq.s32.totalorder %v50_v6, %v84_v33 }
  0x95   :  { %637 = vmatpush.msra.mxu2 %v475_v8  ;;  %vm78_vm14 = vmor %vm68_vm12, %vm76_vm13 }
  0x96   :  { %324 = vmatmul.f32.vlgmr.msra.gmra.mxu3 %v2186_v28  ;;  %v159_v31 = vsub.f32 %v2181_v21, %v2186_v28  ;;  %600 = vmatpush.msra.mxu1 %v2061_v10  ;;  %vm88_vm0 = vmor %vm78_vm14, %vm86_vm15 }
  0x97   :  { %641 = vmatpush.msra.mxu2 %v481_v16  ;;  %690 = vmatpush.msra.mxu3 %v2047_v3 }
  0x98   :  { %v160_v23 = vand.u32 4294901760, %v159_v31  ;;  %602 = vmatpush.msra.mxu1 %v2074_v17 }
  0x99   :  { %645 = vmatpush.msra.mxu2 %v487_v22  ;;  %692 = vmatpush.msra.mxu3 %v2052_v12  ;;  %v731_v22 = vld [vmem:[#allocation5 + $0x68] sm:$0xff] }
  0x9a   :  { %161 = vmatmul.f32.vlgmr.msra.gmra.mxu0 %v160_v23  ;;  %604 = vmatpush.msra.mxu1 %v2088_v24 }
  0x9b   :  { %550 = vmatpush.msra.mxu0 %v2055_v13  ;;  %649 = vmatpush.msra.mxu2 %v493_v20  ;;  %v94_v8 = vpop.permute.xlu1 %93  ;;  %v730_v20 = vld [vmem:[#allocation5 + $0x60] sm:$0xff] }
  0x9c   :  { %694 = vmatpush.msra.mxu3 %v2061_v10  ;;  %606 = vmatpush.msra.mxu1 %v2098_v29  ;;  %vm96_vm1 = vcmp.eq.s32.totalorder %v50_v6, %v94_v8  ;;  %v2366_v6 = vand.u32 4294901760, %v725_v0 }
  0x9d   :  { %553 = vmatpush.msra.mxu0 %v2064_v9  ;;  %653 = vmatpush.msra.mxu2 %v499_v36  ;;  %vm98_vm2 = vmor %vm88_vm0, %vm96_vm1 }
  0x9e   :  { %696 = vmatpush.msra.mxu3 %v2074_v17  ;;  %608 = vmatpush.msra.mxu1 %v2106_v34  ;;  %v2213_v3 = vsel %vm98_vm2, 1.0, %v1888_v55  ;;  %v733_v17 = vld [vmem:[#allocation5 + $0x78] sm:$0xff]  ;;  %v2377_v19 = vsub.f32 %v725_v0, %v2366_v6 }
  0x9f   :  { %556 = vmatpush.msra.mxu0 %v2077_v18  ;;  %657 = vmatpush.msra.mxu2 %v505_v39  ;;  %v128_v12 = vsel %vm123_vm8, %v2213_v3, 0  ;;  %v732_v18 = vld [vmem:[#allocation5 + $0x70] sm:$0xff] }
  0xa0   :  { %1754 = vmatmul.msk.f32.gmra.mxu1 %vm123_vm8, %v2213_v3  ;;  %698 = vmatpush.msra.mxu3 %v2088_v24  ;;  %v2223_v13 = vsub.f32 %v128_v12, %v128_v12  ;;  %v2253_v24 = vand.u32 4294901760, %v733_v17  ;;  %v846_v33 = vand.u32 4294901760, %v2377_v19 }
  0xa1   :  { %610 = vmatpush.msra.mxu1 %v2120_v40  ;;  %559 = vmatpush.msra.mxu0 %v2091_v25  ;;  %v2255_v25 = vand.u32 4294901760, %v732_v18 }
  0xa2   :  { %661 = vmatpush.msra.mxu2 %v511_v46  ;;  %700 = vmatpush.msra.mxu3 %v2098_v29  ;;  %v2232_v10 = vand.u32 4294901760, %v2223_v13  ;;  %v2257_v29 = vand.u32 4294901760, %v731_v22 }
  0xa3   :  { %291 = vmatmul.f32.gmra.mxu2 %v2223_v13  ;;  %612 = vmatpush.msra.mxu1 %v2136_v47 }
  0xa4   :  { %562 = vmatpush.msra.mxu0 %v2104_v30  ;;  %665 = vmatpush.msra.mxu2 %v517_v56  ;;  %v167_v9 = vsub.f32 %v2223_v13, %v2232_v10  ;;  %v2259_v30 = vand.u32 4294901760, %v730_v20  ;;  %v2270_v36 = vsub.f32 %v731_v22, %v2257_v29  ;;  %v2330_v56 = vsub.f32 %v729_v51, %v2327_v52 }
  0xa5   :  { %330 = vmatmul.f32.gmra.mxu3 %v2232_v10  ;;  %614 = vmatpush.msra.mxu1 %v2149_v57 }
  0xa6   :  { %702 = vmatpush.msra.mxu3 %v2106_v34  ;;  %565 = vmatpush.msra.mxu0 %v2109_v35  ;;  %v168_v16 = vand.u32 4294901760, %v167_v9  ;;  %v2264_v34 = vsub.f32 %v733_v17, %v2253_v24  ;;  %v2267_v35 = vsub.f32 %v732_v18, %v2255_v25  ;;  %v2275_v37 = vsub.f32 %v730_v20, %v2259_v30  ;;  %v721_v9 = vld [vmem:[#allocation5 + $0x18] sm:$0xff] }
  0xa7   :  { %669 = vmatpush.msra.mxu2 %v523_v43  ;;  %v822_v54 = vand.u32 4294901760, %v2330_v56  ;;  %v2411_v22 = vand.u32 4294901760, %v721_v9 }
  0xa8   :  { %1757 = vmatmul.msk.f32.vlgmr.msrb.gmra.mxu1 %vm123_vm8, %v2175_v5  ;;  %704 = vmatpush.msra.mxu3 %v2120_v40  ;;  %v798_v39 = vand.u32 4294901760, %v2264_v34  ;;  %v804_v40 = vand.u32 4294901760, %v2267_v35  ;;  %v816_v27 = vand.u32 4294901760, %v2275_v37 }
  0xa9   :  { %169 = vmatmul.f32.gmra.mxu0 %v168_v16  ;;  %673 = vmatpush.msra.mxu2 %v529_v63  ;;  %v2352_v63 = vand.u32 4294901760, %v726_v61 }
  0xaa   :  { %568 = vmatpush.msra.mxu0 %v2123_v41  ;;  %706 = vmatpush.msra.mxu3 %v2136_v47  ;;  %v810_v41 = vand.u32 4294901760, %v2270_v36  ;;  %v799_v42 = vsub.f32 %v2264_v34, %v798_v39  ;;  %v805_v44 = vsub.f32 %v2267_v35, %v804_v40 }
  0xab   :  { %455 = vmatmul.f32.vlgmr.msrb.gmra.mxu2 %v160_v23  ;;  %v2362_v4 = vsub.f32 %v726_v61, %v2352_v63  ;;  %v722_v23 = vld [vmem:[#allocation5 + $0x20] sm:$0xff] }
  0xac   :  { %571 = vmatpush.msra.mxu0 %v2139_v48  ;;  %708 = vmatpush.msra.mxu3 %v2149_v57  ;;  %v811_v45 = vsub.f32 %v2270_v36, %v810_v41  ;;  %v800_v46 = vand.u32 4294901760, %v799_v42  ;;  %v806_v47 = vand.u32 4294901760, %v805_v44  ;;  %v817_v48 = vsub.f32 %v2275_v37, %v816_v27  ;;  %v720_v42 = vld [vmem:[#allocation5 + $0x10] sm:$0xff] }
  0xad   :  { %1759 = vmatmul.msk.f32.vlgmr.msrb.gmra.mxu3 %vm123_vm8, %v2175_v5  ;;  %903 = vmatpush.msrb.mxu2 %v2264_v34  ;;  %v2332_v57 = vand.u32 4294901760, %v728_v53  ;;  %v840_v55 = vand.u32 4294901760, %v2362_v4 }
  0xae   :  { %574 = vmatpush.msra.mxu0 %v2155_v38  ;;  %961 = vmatpush.msrb.mxu3 %v2253_v24  ;;  %v812_v32 = vand.u32 4294901760, %v811_v45  ;;  %v818_v50 = vand.u32 4294901760, %v817_v48  ;;  %v727_v38 = vld [vmem:[#allocation5 + $0x48] sm:$0xff]  ;;  %v2424_v48 = vand.u32 4294901760, %v720_v42 }
  0xaf   :  { %906 = vmatpush.msrb.mxu2 %v2267_v35  ;;  %801 = vmatpush.msrb.mxu1 %v800_v46  ;;  %v2338_v58 = vsub.f32 %v728_v53, %v2332_v57  ;;  %v2340_v60 = vand.u32 4294901760, %v727_v38  ;;  %v841_v26 = vsub.f32 %v2362_v4, %v840_v55  ;;  %v737_v35 = vld [vmem:[#allocation5 + $0x98] sm:$0xff] }
  0xb0   :  { %1758 = vmatmul.msk.f32.gmra.mxu1 %vm123_vm8, %v2213_v3  ;;  %577 = vmatpush.msra.mxu0 %v2162_v62  ;;  %v823_v62 = vsub.f32 %v2330_v56, %v822_v54  ;;  %v875_v61 = vsub.f32 %v720_v42, %v2424_v48 }
  0xb1   :  { %1755 = vmatmul.msk.f32.vlgmr.msrb.gmra.mxu0 %vm123_vm8, %v2175_v5  ;;  %963 = vmatpush.msrb.mxu3 %v2255_v25  ;;  %v828_v43 = vand.u32 4294901760, %v2338_v58  ;;  %v2350_v59 = vsub.f32 %v727_v38, %v2340_v60  ;;  %v842_v8 = vand.u32 4294901760, %v841_v26 }
  0xb2   :  { %748 = vmatpush.msrb.mxu0 %v2253_v24  ;;  %909 = vmatpush.msrb.mxu2 %v2270_v36  ;;  %v824_v1 = vand.u32 4294901760, %v823_v62  ;;  %v718_v62 = vld [vmem:[#allocation5] sm:$0xff]  ;;  %v2486_v36 = vand.u32 4294901760, %v737_v35 }
  0xb3   :  { %463 = vmatmul.f32.gmra.mxu2 %v168_v16  ;;  %807 = vmatpush.msrb.mxu1 %v806_v47  ;;  %v829_v2 = vsub.f32 %v2338_v58, %v828_v43  ;;  %v834_v49 = vand.u32 4294901760, %v2350_v59  ;;  %v2421_v47 = vsub.f32 %v721_v9, %v2411_v22 }
  0xb4   :  { %750 = vmatpush.msrb.mxu0 %v2255_v25  ;;  %912 = vmatpush.msrb.mxu2 %v2275_v37  ;;  %v736_v37 = vld [vmem:[#allocation5 + $0x90] sm:$0xff] }
  0xb5   :  { %1760 = vmatmul.msk.f32.gmra.mxu3 %vm123_vm8, %v2213_v3  ;;  %813 = vmatpush.msrb.mxu1 %v812_v32  ;;  %v830_v11 = vand.u32 4294901760, %v829_v2  ;;  %v835_v15 = vsub.f32 %v2350_v59, %v834_v49  ;;  %v719_v32 = vld [vmem:[#allocation5 + $0x8] sm:$0xff]  ;;  %v870_v53 = vand.u32 4294901760, %v2421_v47 }
  0xb6   :  { %752 = vmatpush.msrb.mxu0 %v2257_v29  ;;  %965 = vmatpush.msrb.mxu3 %v2257_v29  ;;  %v2431_v38 = vand.u32 4294901760, %v719_v32 }
  0xb7   :  { %819 = vmatpush.msrb.mxu1 %v818_v50  ;;  %915 = vmatpush.msrb.mxu2 %v2330_v56  ;;  %v836_v7 = vand.u32 4294901760, %v835_v15 }
  0xb8   :  { %618 = vmatmul.f32.vlgmr.msra.gmra.mxu1 %v2186_v28  ;;  %754 = vmatpush.msrb.mxu0 %v2259_v30  ;;  %v881_v2 = vsub.f32 %v719_v32, %v2431_v38 }
  0xb9   :  { %1756 = vmatmul.msk.f32.gmra.mxu0 %vm123_vm8, %v2213_v3  ;;  %967 = vmatpush.msrb.mxu3 %v2259_v30 }
  0xba   :  { %756 = vmatpush.msrb.mxu0 %v2327_v52  ;;  %918 = vmatpush.msrb.mxu2 %v2338_v58 }
  0xbb   :  { %1761 = vmatmul.msk.f32.vlgmr.msra.gmra.mxu2 %vm123_vm8, %v2175_v5  ;;  %969 = vmatpush.msrb.mxu3 %v2327_v52 }
  0xbc   :  { %758 = vmatpush.msrb.mxu0 %v2332_v57  ;;  %921 = vmatpush.msrb.mxu2 %v2350_v59 }
  0xbd   :  { %1763 = vmatmul.msk.f32.vlgmr.msra.gmra.mxu3 %vm123_vm8, %v2175_v5  ;;  %825 = vmatpush.msrb.mxu1 %v824_v1  ;;  %v2373_v5 = vand.u32 4294901760, %v724_v14  ;;  %v871_v1 = vsub.f32 %v2421_v47, %v870_v53 }
  0xbe   :  { %971 = vmatpush.msrb.mxu3 %v2332_v57  ;;  %760 = vmatpush.msrb.mxu0 %v2340_v60 }
  0xbf   :  { %924 = vmatpush.msrb.mxu2 %v2362_v4  ;;  %831 = vmatpush.msrb.mxu1 %v830_v11  ;;  %v2385_v28 = vsub.f32 %v724_v14, %v2373_v5  ;;  %v2439_v14 = vand.u32 4294901760, %v718_v62  ;;  %v876_v11 = vand.u32 4294901760, %v875_v61  ;;  %v872_v15 = vand.u32 4294901760, %v871_v1 }
  0xc0   :  { %624 = vmatmul.f32.gmra.mxu1 %v2232_v10  ;;  %973 = vmatpush.msrb.mxu3 %v2340_v60  ;;  %v847_v10 = vsub.f32 %v2377_v19, %v846_v33 }
  0xc1   :  { %580 = vmatmul.f32.vlgmr.msra.gmra.mxu0 %v2181_v21  ;;  %v723_v21 = vld [vmem:[#allocation5 + $0x28] sm:$0xff]  ;;  %927 = vmatpush.msrb.mxu2 %v2377_v19  ;;  %v877_v26 = vsub.f32 %v875_v61, %v876_v11 }
  0xc2   :  { %762 = vmatpush.msrb.mxu0 %v2352_v63  ;;  %975 = vmatpush.msrb.mxu3 %v2352_v63  ;;  %v2387_v31 = vand.u32 4294901760, %v723_v21  ;;  %v848_v20 = vand.u32 4294901760, %v847_v10 }
  0xc3   :  { %1762 = vmatmul.msk.f32.gmra.mxu2 %vm123_vm8, %v2213_v3  ;;  %837 = vmatpush.msrb.mxu1 %v836_v7  ;;  %v887_v7 = vsub.f32 %v718_v62, %v2439_v14  ;;  %v878_v10 = vand.u32 4294901760, %v877_v26 }
  0xc4   :  { %764 = vmatpush.msrb.mxu0 %v2366_v6  ;;  %977 = vmatpush.msrb.mxu3 %v2366_v6  ;;  %v2394_v12 = vsub.f32 %v723_v21, %v2387_v31  ;;  %v882_v21 = vand.u32 4294901760, %v881_v2 }
  0xc5   :  { %1764 = vmatmul.msk.f32.gmra.mxu3 %vm123_vm8, %v2213_v3  ;;  %v852_v3 = vand.u32 4294901760, %v2385_v28  ;;  %930 = vmatpush.msrb.mxu2 %v2385_v28 }
  0xc6   :  { %766 = vmatpush.msrb.mxu0 %v2373_v5  ;;  %979 = vmatpush.msrb.mxu3 %v2373_v5  ;;  %v858_v17 = vand.u32 4294901760, %v2394_v12 }
  0xc7   :  { %843 = vmatpush.msrb.mxu1 %v842_v8  ;;  %v853_v16 = vsub.f32 %v2385_v28, %v852_v3  ;;  %933 = vmatpush.msrb.mxu2 %v2394_v12  ;;  %v888_v8 = vand.u32 4294901760, %v887_v7 }
  0xc8   :  { %768 = vmatpush.msrb.mxu0 %v2387_v31  ;;  %981 = vmatpush.msrb.mxu3 %v2387_v31  ;;  %v859_v45 = vsub.f32 %v2394_v12, %v858_v17 }
  0xc9   :  { %585 = vmatmul.f32.gmra.mxu0 %v2223_v13  ;;  %v2396_v13 = vand.u32 4294901760, %v722_v23  ;;  %v854_v44 = vand.u32 4294901760, %v853_v16  ;;  %849 = vmatpush.msrb.mxu1 %v848_v20  ;;  %v889_v16 = vsub.f32 %v887_v7, %v888_v8 }
  0xca   :  { %v860_v50 = vand.u32 4294901760, %v859_v45 }
  0xcb   :  { %v2409_v18 = vsub.f32 %v722_v23, %v2396_v13  ;;  %770 = vmatpush.msrb.mxu0 %v2396_v13  ;;  %983 = vmatpush.msrb.mxu3 %v2396_v13  ;;  %v883_v23 = vsub.f32 %v881_v2, %v882_v21  ;;  %v890_v20 = vand.u32 4294901760, %v889_v16 }
  0xcc   :  { %855 = vmatpush.msrb.mxu1 %v854_v44 }
  0xcd   :  { %v864_v46 = vand.u32 4294901760, %v2409_v18  ;;  %772 = vmatpush.msrb.mxu0 %v2411_v22  ;;  %936 = vmatpush.msrb.mxu2 %v2409_v18  ;;  %v884_v9 = vand.u32 4294901760, %v883_v23 }
  0xce   :  { %985 = vmatpush.msrb.mxu3 %v2411_v22  ;;  %861 = vmatpush.msrb.mxu1 %v860_v50 }
  0xcf   :  { %v865_v51 = vsub.f32 %v2409_v18, %v864_v46  ;;  %774 = vmatpush.msrb.mxu0 %v2424_v48  ;;  %939 = vmatpush.msrb.mxu2 %v2421_v47 }
  0xd0   :  { %987 = vmatpush.msrb.mxu3 %v2424_v48 }
  0xd1   :  { %v866_v0 = vand.u32 4294901760, %v865_v51  ;;  %776 = vmatpush.msrb.mxu0 %v2431_v38  ;;  %942 = vmatpush.msrb.mxu2 %v875_v61 }
  0xd2   :  { %989 = vmatpush.msrb.mxu3 %v2431_v38 }
  0xd3   :  { %867 = vmatpush.msrb.mxu1 %v866_v0  ;;  %778 = vmatpush.msrb.mxu0 %v2439_v14 }
  0xd4   :  { %945 = vmatpush.msrb.mxu2 %v881_v2  ;;  %991 = vmatpush.msrb.mxu3 %v2439_v14 }
  0xd5   :  { %1008 = vmatpush.msra.mxu0 %v798_v39  ;;  %873 = vmatpush.msrb.mxu1 %v872_v15  ;;  %v2491_v39 = vsub.f32 %v737_v35, %v2486_v36 }
  0xd6   :  { %948 = vmatpush.msrb.mxu2 %v887_v7 }
  0xd7   :  { %1012 = vmatpush.msra.mxu0 %v804_v40  ;;  %879 = vmatpush.msrb.mxu1 %v878_v10  ;;  %v2493_v40 = vand.u32 4294901760, %v736_v37 }
  0xd8   :  { %1765 = vmatpush.msra.mxu2 %v2486_v36 }
  0xd9   :  { %1016 = vmatpush.msra.mxu0 %v810_v41  ;;  %885 = vmatpush.msrb.mxu1 %v884_v9  ;;  %v735_v41 = vld [vmem:[#allocation5 + $0x88] sm:$0xff]  ;;  %v2498_v56 = vsub.f32 %v736_v37, %v2493_v40 }
  0xda   :  { %1766 = vmatpush.msra.mxu2 %v2493_v40 }
  0xdb   :  { %1020 = vmatpush.msra.mxu0 %v816_v27  ;;  %891 = vmatpush.msrb.mxu1 %v890_v20  ;;  %v1176_v59 = vand.u32 4294901760, %v2498_v56 }
  0xdd   :  { %1079 = vmatpush.msra.mxu1 %v2253_v24  ;;  %1024 = vmatpush.msra.mxu0 %v822_v54 }
  0xdf   :  { %1081 = vmatpush.msra.mxu1 %v2255_v25  ;;  %1028 = vmatpush.msra.mxu0 %v828_v43 }
  0xe1   :  { %1083 = vmatpush.msra.mxu1 %v2257_v29  ;;  %1032 = vmatpush.msra.mxu0 %v834_v49 }
  0xe3   :  { %1085 = vmatpush.msra.mxu1 %v2259_v30  ;;  %1036 = vmatpush.msra.mxu0 %v840_v55 }
  0xe5   :  { %1087 = vmatpush.msra.mxu1 %v2327_v52  ;;  %1040 = vmatpush.msra.mxu0 %v846_v33  ;;  %v1170_v52 = vand.u32 4294901760, %v2491_v39 }
  0xe7   :  { %1089 = vmatpush.msra.mxu1 %v2332_v57  ;;  %1044 = vmatpush.msra.mxu0 %v852_v3  ;;  %v2501_v57 = vand.u32 4294901760, %v735_v41  ;;  %v1171_v43 = vsub.f32 %v2491_v39, %v1170_v52 }
  0xe9   :  { %1091 = vmatpush.msra.mxu1 %v2340_v60  ;;  %1048 = vmatpush.msra.mxu0 %v858_v17  ;;  %v734_v60 = vld [vmem:[#allocation5 + $0x80] sm:$0xff]  ;;  %v1172_v55 = vand.u32 4294901760, %v1171_v43 }
  0xea   :  { %1767 = vmatpush.msra.mxu2 %v2501_v57  ;;  %v2511_v4 = vand.u32 4294901760, %v734_v60 }
  0xeb   :  { %1093 = vmatpush.msra.mxu1 %v2352_v63  ;;  %1052 = vmatpush.msra.mxu0 %v864_v46  ;;  %v2508_v63 = vsub.f32 %v735_v41, %v2501_v57 }
  0xec   :  { %1768 = vmatpush.msra.mxu2 %v2511_v4  ;;  %1769 = vmatpush.msra.mxu3 %v1172_v55 }
  0xed   :  { %1095 = vmatpush.msra.mxu1 %v2366_v6  ;;  %1056 = vmatpush.msra.mxu0 %v870_v53  ;;  %v1182_v19 = vand.u32 4294901760, %v2508_v63 }
  0xef   :  { %1097 = vmatpush.msra.mxu1 %v2373_v5  ;;  %1060 = vmatpush.msra.mxu0 %v876_v11  ;;  %v1177_v5 = vsub.f32 %v2498_v56, %v1176_v59  ;;  %v1183_v3 = vsub.f32 %v2508_v63, %v1182_v19 }
  0xf1   :  { %1099 = vmatpush.msra.mxu1 %v2387_v31  ;;  %1064 = vmatpush.msra.mxu0 %v882_v21  ;;  %v2518_v31 = vsub.f32 %v734_v60, %v2511_v4  ;;  %v1178_v33 = vand.u32 4294901760, %v1177_v5  ;;  %v1184_v18 = vand.u32 4294901760, %v1183_v3 }
  0xf3   :  { %1101 = vmatpush.msra.mxu1 %v2396_v13  ;;  %1068 = vmatpush.msra.mxu0 %v888_v8  ;;  %v1188_v12 = vand.u32 4294901760, %v2518_v31 }
  0xf4   :  { %1770 = vmatpush.msra.mxu3 %v1178_v33 }
  0xf5   :  { %1103 = vmatpush.msra.mxu1 %v2411_v22  ;;  %v1189_v44 = vsub.f32 %v2518_v31, %v1188_v12 }
  0xf6   :  { %1771 = vmatpush.msra.mxu3 %v1184_v18 }
  0xf7   :  { %1105 = vmatpush.msra.mxu1 %v2424_v48  ;;  %v1190_v47 = vand.u32 4294901760, %v1189_v44 }
  0xf9   :  { %1107 = vmatpush.msra.mxu1 %v2431_v38  ;;  %1772 = vmatpush.msra.mxu3 %v1190_v47 }
  0xfb   :  { %1109 = vmatpush.msra.mxu1 %v2439_v14 }
 0x10e   :  { %v241_v24 = vpop.f32.mrf.mxu1 }
 0x117   :  { %v162_v25 = vpop.f32.mrf.mxu0  ;;  %v287_v29 = vpop.f32.mrf.mxu2 }
 0x118   :  { %v242_v27 = vadd.f32 %v241_v24, %v162_v25 }
 0x119   :  { %v325_v30 = vpop.f32.mrf.mxu3 }
 0x11a   :  { %v288_v6 = vadd.f32 %v287_v29, %v242_v27 }
 0x11c   :  { %v326_v13 = vadd.f32 %v325_v30, %v288_v6 }
 0x11d   :  { %v245_v34 = vpop.f32.mrf.mxu1 }
 0x125   :  { %v417_v28 = vpop.f32.mrf.mxu1 }
 0x126   :  { %v170_v54 = vpop.f32.mrf.mxu0  ;;  %v292_v58 = vpop.f32.mrf.mxu2 }
 0x127   :  { %v246_v17 = vadd.f32 %v245_v34, %v170_v54 }
 0x128   :  { %v331_v49 = vpop.f32.mrf.mxu3 }
 0x129   :  { %v293_v48 = vadd.f32 %v292_v58, %v246_v17 }
 0x12b   :  { %v332_v53 = vadd.f32 %v331_v49, %v293_v48 }
 0x12d   :  { %v421_v51 = vpop.f32.mrf.mxu1 }
 0x12e   :  { %v382_v22 = vpop.f32.mrf.mxu0  ;;  %v456_v42 = vpop.f32.mrf.mxu2 }
 0x12f   :  { %v383_v45 = vadd.f32 %v382_v22, %v326_v13  ;;  %v1351_v22 = vld [vmem:[#allocation5 + $0x108] sm:$0xff] }
 0x130   :  { %v535_v46 = vpop.f32.mrf.mxu3 }
 0x131   :  { %v418_v32 = vadd.f32 %v417_v28, %v383_v45  ;;  %v536_v7 = vadd.f32 %v535_v46, %v456_v42  ;;  %v2585_v46 = vand.u32 4294901760, %v1351_v22 }
 0x133   :  { %v2528_v50 = vand.u32 4294901760, %v418_v32 }
 0x135   :  { %v780_v38 = vsub.f32 %v418_v32, %v2528_v50  ;;  %893 = vmatmul.f32.vlgmr.msrb.gmra.mxu1 %v2528_v50  ;;  %v619_v23 = vpop.f32.mrf.mxu1 }
 0x136   :  { %v386_v61 = vpop.f32.mrf.mxu0  ;;  %v464_v62 = vpop.f32.mrf.mxu2  ;;  %1173 = vmatpush.msrb.mxu1 %v1172_v55 }
 0x137   :  { %v387_v0 = vadd.f32 %v386_v61, %v332_v53  ;;  %951 = vmatmul.f32.vlgmr.msrb.gmra.mxu2 %v780_v38  ;;  %v781_v1 = vand.u32 4294901760, %v780_v38 }
 0x138   :  { %v539_v2 = vpop.f32.mrf.mxu3  ;;  %1179 = vmatpush.msrb.mxu1 %v1178_v33  ;;  %1215 = vmatpush.msrb.mxu2 %v2491_v39 }
 0x139   :  { %v422_v14 = vadd.f32 %v421_v51, %v387_v0  ;;  %995 = vmatmul.f32.vlgmr.msrb.gmra.mxu3 %v781_v1  ;;  %v782_v11 = vsub.f32 %v780_v38, %v781_v1  ;;  %v540_v34 = vadd.f32 %v539_v2, %v464_v62  ;;  %v2595_v51 = vsub.f32 %v1351_v22, %v2585_v46  ;;  %v1349_v38 = vld [vmem:[#allocation5 + $0xf8] sm:$0xff] }
 0x13a   :  { %1185 = vmatpush.msrb.mxu1 %v1184_v18  ;;  %1249 = vmatpush.msrb.mxu3 %v2486_v36  ;;  %v2606_v1 = vand.u32 4294901760, %v1349_v38 }
 0x13b   :  { %v787_v15 = vand.u32 4294901760, %v422_v14  ;;  %v783_v21 = vand.u32 4294901760, %v782_v11  ;;  %1218 = vmatpush.msrb.mxu2 %v2498_v56  ;;  %v1354_v56 = vld [vmem:[#allocation5 + $0x120] sm:$0xff]  ;;  %v1426_v0 = vand.u32 4294901760, %v2595_v51 }
 0x13c   :  { %1191 = vmatpush.msrb.mxu1 %v1190_v47  ;;  %1251 = vmatpush.msrb.mxu3 %v2493_v40  ;;  %v1350_v47 = vld [vmem:[#allocation5 + $0x100] sm:$0xff] }
 0x13d   :  { %784 = vmatmul.f32.vlgmr.msrb.gmra.mxu0 %v783_v21  ;;  %897 = vmatmul.f32.gmra.mxu1 %v787_v15  ;;  %v788_v26 = vsub.f32 %v422_v14, %v787_v15  ;;  %v625_v27 = vpop.f32.mrf.mxu1  ;;  %v2599_v53 = vand.u32 4294901760, %v1350_v47  ;;  %v1348_v14 = vld [vmem:[#allocation5 + $0xf0] sm:$0xff]  ;;  %v2618_v21 = vsub.f32 %v1349_v38, %v2606_v1 }
 0x13e   :  { %v581_v8 = vpop.f32.mrf.mxu0  ;;  %1132 = vmatpush.msrb.mxu0 %v2486_v36  ;;  %1253 = vmatpush.msrb.mxu3 %v2501_v57  ;;  %v676_v16 = vpop.f32.mrf.mxu2 }
 0x13f   :  { %v582_v10 = vadd.f32 %v581_v8, %v536_v7  ;;  %956 = vmatmul.f32.gmra.mxu2 %v788_v26  ;;  %v789_v9 = vand.u32 4294901760, %v788_v26  ;;  %v2610_v2 = vsub.f32 %v1350_v47, %v2599_v53  ;;  %v2620_v7 = vand.u32 4294901760, %v1348_v14 }
 0x140   :  { %1134 = vmatpush.msrb.mxu0 %v2493_v40  ;;  %1255 = vmatpush.msrb.mxu3 %v2511_v4  ;;  %v711_v25 = vpop.f32.mrf.mxu3 }
 0x141   :  { %v620_v20 = vadd.f32 %v619_v23, %v582_v10  ;;  %1001 = vmatmul.f32.gmra.mxu3 %v789_v9  ;;  %v790_v24 = vsub.f32 %v788_v26, %v789_v9  ;;  %1221 = vmatpush.msrb.mxu2 %v2508_v63  ;;  %v1353_v63 = vld [vmem:[#allocation5 + $0x118] sm:$0xff]  ;;  %v1432_v26 = vand.u32 4294901760, %v2610_v2  ;;  %v1347_v23 = vld [vmem:[#allocation5 + $0xe8] sm:$0xff]  ;;  %v1438_v10 = vand.u32 4294901760, %v2618_v21 }
 0x142   :  { %1136 = vmatpush.msrb.mxu0 %v2501_v57  ;;  %v2627_v9 = vsub.f32 %v1348_v14, %v2620_v7  ;;  %v1340_v14 = vld [vmem:[#allocation5 + $0xb0] sm:$0xff] }
 0x143   :  { %v677_v29 = vadd.f32 %v676_v16, %v620_v20  ;;  %v791_v30 = vand.u32 4294901760, %v790_v24  ;;  %1224 = vmatpush.msrb.mxu2 %v2518_v31  ;;  %v2565_v31 = vand.u32 4294901760, %v1353_v63  ;;  %v2629_v16 = vand.u32 4294901760, %v1347_v23  ;;  %v1346_v24 = vld [vmem:[#allocation5 + $0xe0] sm:$0xff] }
 0x144   :  { %1138 = vmatpush.msrb.mxu0 %v2511_v4  ;;  %v1433_v20 = vsub.f32 %v2610_v2, %v1432_v26 }
 0x145   :  { %v712_v35 = vadd.f32 %v711_v25, %v677_v29  ;;  %792 = vmatmul.f32.gmra.mxu0 %v791_v30  ;;  %1111 = vmatmul.f32.vlgmr.msra.gmra.mxu1 %v2528_v50  ;;  %v2571_v17 = vsub.f32 %v1353_v63, %v2565_v31  ;;  %v1439_v25 = vsub.f32 %v2618_v21, %v1438_v10  ;;  %v1444_v29 = vand.u32 4294901760, %v2627_v9 }
 0x146   :  { %v586_v37 = vpop.f32.mrf.mxu0  ;;  %1319 = vmatpush.msra.mxu1 %v2486_v36  ;;  %v680_v60 = vpop.f32.mrf.mxu2  ;;  %v2642_v30 = vsub.f32 %v1347_v23, %v2629_v16 }
 0x147   :  { %v587_v41 = vadd.f32 %v586_v37, %v540_v34  ;;  %v742_v54 = vsel %vm740_vm3, %v712_v35, 0  ;;  %v1414_v44 = vand.u32 4294901760, %v2571_v17  ;;  %v2644_v34 = vand.u32 4294901760, %v1346_v24  ;;  %v1345_v37 = vld [vmem:[#allocation5 + $0xd8] sm:$0xff] }
 0x148   :  { %1321 = vmatpush.msra.mxu1 %v2493_v40  ;;  %v1139_v43 = vand.u32 4294901760, %v742_v54  ;;  %v715_v6 = vpop.f32.mrf.mxu3  ;;  %v1434_v35 = vand.u32 4294901760, %v1433_v20 }
 0x149   :  { %v626_v58 = vadd.f32 %v625_v27, %v587_v41  ;;  %v1415_v32 = vsub.f32 %v2571_v17, %v1414_v44  ;;  %v1440_v41 = vand.u32 4294901760, %v1439_v25  ;;  %v1445_v27 = vsub.f32 %v2627_v9, %v1444_v29  ;;  %v1339_v25 = vld [vmem:[#allocation5 + $0xa8] sm:$0xff] }
 0x14a   :  { %1323 = vmatpush.msra.mxu1 %v2501_v57  ;;  %v1140_v36 = vsub.f32 %v742_v54, %v1139_v43  ;;  %v1450_v54 = vand.u32 4294901760, %v2642_v30 }
 0x14b   :  { %v681_v49 = vadd.f32 %v680_v60, %v626_v58  ;;  %v1416_v61 = vand.u32 4294901760, %v1415_v32  ;;  %v2654_v58 = vsub.f32 %v1346_v24, %v2644_v34  ;;  %v2657_v60 = vand.u32 4294901760, %v1345_v37 }
 0x14c   :  { %1325 = vmatpush.msra.mxu1 %v2511_v4  ;;  %v1141_v4 = vand.u32 4294901760, %v1140_v36  ;;  %v2719_v24 = vand.u32 4294901760, %v1340_v14 }
 0x14d   :  { %v716_v55 = vadd.f32 %v715_v6, %v681_v49  ;;  %1070 = vmatmul.f32.vlgmr.msra.gmra.mxu0 %v2528_v50  ;;  %1115 = vmatmul.f32.gmra.mxu1 %v787_v15  ;;  %v1446_v49 = vand.u32 4294901760, %v1445_v27  ;;  %v1451_v6 = vsub.f32 %v2642_v30, %v1450_v54 }
 0x14e   :  { %1284 = vmatpush.msra.mxu0 %v1170_v52  ;;  %v1142_v52 = vsub.f32 %v1140_v36, %v1141_v4  ;;  %v2729_v27 = vsub.f32 %v1340_v14, %v2719_v24 }
 0x14f   :  { %v745_v5 = vsel %vm740_vm3, %v716_v55, 0  ;;  %v1456_v55 = vand.u32 4294901760, %v2654_v58 }
 0x150   :  { %v1147_v40 = vand.u32 4294901760, %v745_v5  ;;  %1288 = vmatpush.msra.mxu0 %v1176_v59  ;;  %v1143_v3 = vand.u32 4294901760, %v1142_v52  ;;  %v2560_v59 = vand.u32 4294901760, %v1354_v56 }
 0x152   :  { %v1148_v57 = vsub.f32 %v745_v5, %v1147_v40  ;;  %1197 = vmatmul.f32.vlgmr.msra.gmra.mxu3 %v1147_v40  ;;  %1292 = vmatpush.msra.mxu0 %v1182_v19  ;;  %v2563_v19 = vsub.f32 %v1354_v56, %v2560_v59  ;;  %v2669_v5 = vsub.f32 %v1345_v37, %v2657_v60 }
 0x154   :  { %v1149_v28 = vand.u32 4294901760, %v1148_v57  ;;  %1296 = vmatpush.msra.mxu0 %v1188_v12  ;;  %v1352_v12 = vld [vmem:[#allocation5 + $0x110] sm:$0xff]  ;;  %v1408_v13 = vand.u32 4294901760, %v2563_v19  ;;  %v1462_v52 = vand.u32 4294901760, %v2669_v5 }
 0x155   :  { %1074 = vmatmul.f32.gmra.mxu0 %v787_v15  ;;  %1193 = vmatmul.f32.vlgmr.msrb.gmra.mxu1 %v1139_v43  ;;  %v2573_v18 = vand.u32 4294901760, %v1352_v12  ;;  %v1427_v15 = vsub.f32 %v2595_v51, %v1426_v0 }
 0x156   :  { %v1150_v39 = vsub.f32 %v1148_v57, %v1149_v28  ;;  %1571 = vmatpush.msrb.mxu1 %v2560_v59  ;;  %v1409_v42 = vsub.f32 %v2563_v19, %v1408_v13  ;;  %v1463_v22 = vsub.f32 %v2669_v5, %v1462_v52 }
 0x157   :  { %v2583_v45 = vsub.f32 %v1352_v12, %v2573_v18  ;;  %v1428_v8 = vand.u32 4294901760, %v1427_v15 }
 0x158   :  { %v1151_v33 = vand.u32 4294901760, %v1150_v39  ;;  %1573 = vmatpush.msrb.mxu1 %v2565_v31  ;;  %v1410_v48 = vand.u32 4294901760, %v1409_v42  ;;  %v1341_v42 = vld [vmem:[#allocation5 + $0xb8] sm:$0xff] }
 0x159   :  { %v1420_v50 = vand.u32 4294901760, %v2583_v45 }
 0x15a   :  { %1152 = vmatmul.f32.vlgmr.msra.gmra.mxu2 %v1151_v33  ;;  %1259 = vmatmul.f32.vlgmr.msrb.gmra.mxu3 %v1141_v4  ;;  %v1457_v4 = vsub.f32 %v2654_v58, %v1456_v55  ;;  %v1342_v33 = vld [vmem:[#allocation5 + $0xc0] sm:$0xff] }
 0x15b   :  { %1358 = vmatpush.msra.mxu2 %v2560_v59  ;;  %1575 = vmatpush.msrb.mxu1 %v2573_v18  ;;  %v1421_v62 = vsub.f32 %v2583_v45, %v1420_v50  ;;  %v2688_v12 = vand.u32 4294901760, %v1342_v33 }
 0x15c   :  { %1411 = vmatpush.msra.mxu3 %v1410_v48 }
 0x15d   :  { %1144 = vmatmul.f32.vlgmr.msrb.gmra.mxu0 %v1143_v3  ;;  %1327 = vmatmul.f32.vlgmr.msra.gmra.mxu1 %v1139_v43  ;;  %v1422_v11 = vand.u32 4294901760, %v1421_v62  ;;  %v1458_v3 = vand.u32 4294901760, %v1457_v4  ;;  %v2703_v38 = vsub.f32 %v1342_v33, %v2688_v12  ;;  %v1464_v62 = vand.u32 4294901760, %v1463_v22 }
 0x15e   :  { %1360 = vmatpush.msra.mxu2 %v2565_v31  ;;  %1513 = vmatpush.msrb.mxu0 %v2563_v19 }
 0x15f   :  { %1577 = vmatpush.msrb.mxu1 %v2585_v46  ;;  %1417 = vmatpush.msra.mxu3 %v1416_v61  ;;  %v2705_v61 = vand.u32 4294901760, %v1341_v42  ;;  %v1480_v23 = vand.u32 4294901760, %v2703_v38 }
 0x160   :  { %1362 = vmatpush.msra.mxu2 %v2573_v18  ;;  %1516 = vmatpush.msrb.mxu0 %v2571_v17  ;;  %v1797_v17 = vld [vmem:[#allocation5 + $0xa0] ss:$0 sm:$0xff] }
 0x161   :  { %1579 = vmatpush.msrb.mxu1 %v2599_v53  ;;  %1423 = vmatpush.msra.mxu3 %v1422_v11  ;;  %v1481_v37 = vsub.f32 %v2703_v38, %v1480_v23 }
 0x162   :  { %1227 = vmatmul.f32.vlgmr.msrb.gmra.mxu2 %v1140_v36  ;;  %1265 = vmatmul.f32.gmra.mxu3 %v1149_v28 }
 0x163   :  { %1364 = vmatpush.msra.mxu2 %v2585_v46  ;;  %1519 = vmatpush.msrb.mxu0 %v2583_v45 }
 0x164   :  { %1581 = vmatpush.msrb.mxu1 %v2606_v1  ;;  %1429 = vmatpush.msra.mxu3 %v1428_v8  ;;  %v2715_v8 = vsub.f32 %v1341_v42, %v2705_v61 }
 0x165   :  { %1298 = vmatmul.f32.vlgmr.msra.gmra.mxu0 %v1139_v43  ;;  %1331 = vmatmul.f32.gmra.mxu1 %v1147_v40  ;;  %v1344_v43 = vld [vmem:[#allocation5 + $0xd0] sm:$0xff] }
 0x166   :  { %1522 = vmatpush.msrb.mxu0 %v2595_v51  ;;  %1366 = vmatpush.msra.mxu2 %v2599_v53  ;;  %v2664_v36 = vand.u32 4294901760, %v1344_v43 }
 0x167   :  { %1583 = vmatpush.msrb.mxu1 %v2620_v7  ;;  %1435 = vmatpush.msra.mxu3 %v1434_v35 }
 0x168   :  { %1368 = vmatpush.msra.mxu2 %v2606_v1  ;;  %1525 = vmatpush.msrb.mxu0 %v2610_v2  ;;  %v2676_v28 = vsub.f32 %v1344_v43, %v2664_v36  ;;  %v2731_v43 = vand.u32 4294901760, %v1339_v25 }
 0x169   :  { %1585 = vmatpush.msrb.mxu1 %v2629_v16  ;;  %1441 = vmatpush.msra.mxu3 %v1440_v41  ;;  %v1486_v41 = vand.u32 4294901760, %v2715_v8 }
 0x16a   :  { %1232 = vmatmul.f32.gmra.mxu2 %v1148_v57  ;;  %1528 = vmatpush.msrb.mxu0 %v2618_v21  ;;  %v1452_v57 = vand.u32 4294901760, %v1451_v6  ;;  %v1468_v56 = vand.u32 4294901760, %v2676_v28 }
 0x16b   :  { %1370 = vmatpush.msra.mxu2 %v2620_v7  ;;  %1587 = vmatpush.msrb.mxu1 %v2644_v34  ;;  %v1487_v6 = vsub.f32 %v2715_v8, %v1486_v41 }
 0x16c   :  { %1531 = vmatpush.msrb.mxu0 %v2627_v9  ;;  %1447 = vmatpush.msra.mxu3 %v1446_v49  ;;  %v1469_v48 = vsub.f32 %v2676_v28, %v1468_v56  ;;  %v1482_v49 = vand.u32 4294901760, %v1481_v37 }
 0x16d   :  { %1302 = vmatmul.f32.gmra.mxu0 %v1147_v40  ;;  %1372 = vmatpush.msra.mxu2 %v2629_v16  ;;  %v1343_v40 = vld [vmem:[#allocation5 + $0xc8] sm:$0xff]  ;;  %v1488_v4 = vand.u32 4294901760, %v1487_v6 }
 0x16e   :  { %1534 = vmatpush.msrb.mxu0 %v2642_v30  ;;  %v2678_v39 = vand.u32 4294901760, %v1343_v40  ;;  %1589 = vmatpush.msrb.mxu1 %v2657_v60  ;;  %v1470_v11 = vand.u32 4294901760, %v1469_v48 }
 0x16f   :  { %1374 = vmatpush.msra.mxu2 %v2644_v34  ;;  %1453 = vmatpush.msra.mxu3 %v1452_v57  ;;  %v2741_v57 = vsub.f32 %v1339_v25, %v2731_v43 }
 0x170   :  { %1537 = vmatpush.msrb.mxu0 %v2654_v58  ;;  %v2686_v63 = vsub.f32 %v1343_v40, %v2678_v39  ;;  %1591 = vmatpush.msrb.mxu1 %v2664_v36  ;;  %v1492_v40 = vand.u32 4294901760, %v2729_v27 }
 0x171   :  { %1376 = vmatpush.msra.mxu2 %v2657_v60  ;;  %1459 = vmatpush.msra.mxu3 %v1458_v3  ;;  %v1498_v3 = vand.u32 4294901760, %v2741_v57 }
 0x172   :  { %1540 = vmatpush.msrb.mxu0 %v2669_v5  ;;  %v1474_v32 = vand.u32 4294901760, %v2686_v63  ;;  %1593 = vmatpush.msrb.mxu1 %v2678_v39  ;;  %v1493_v33 = vsub.f32 %v2729_v27, %v1492_v40 }
 0x173   :  { %1378 = vmatpush.msra.mxu2 %v2664_v36  ;;  %1465 = vmatpush.msra.mxu3 %v1464_v62  ;;  %v1499_v19 = vsub.f32 %v2741_v57, %v1498_v3 }
 0x174   :  { %1543 = vmatpush.msrb.mxu0 %v2676_v28  ;;  %v1475_v15 = vsub.f32 %v2686_v63, %v1474_v32  ;;  %1595 = vmatpush.msrb.mxu1 %v2688_v12  ;;  %v1494_v48 = vand.u32 4294901760, %v1493_v33 }
 0x175   :  { %1380 = vmatpush.msra.mxu2 %v2678_v39  ;;  %1471 = vmatpush.msra.mxu3 %v1470_v11 }
 0x176   :  { %1546 = vmatpush.msrb.mxu0 %v2686_v63  ;;  %v1476_v35 = vand.u32 4294901760, %v1475_v15  ;;  %1597 = vmatpush.msrb.mxu1 %v2705_v61 }
 0x177   :  { %1382 = vmatpush.msra.mxu2 %v2688_v12 }
 0x178   :  { %1549 = vmatpush.msrb.mxu0 %v2703_v38  ;;  %1599 = vmatpush.msrb.mxu1 %v2719_v24 }
 0x179   :  { %1384 = vmatpush.msra.mxu2 %v2705_v61  ;;  %1477 = vmatpush.msra.mxu3 %v1476_v35 }
 0x17a   :  { %1552 = vmatpush.msrb.mxu0 %v2715_v8  ;;  %1601 = vmatpush.msrb.mxu1 %v2731_v43 }
 0x17b   :  { %1386 = vmatpush.msra.mxu2 %v2719_v24  ;;  %1483 = vmatpush.msra.mxu3 %v1482_v49 }
 0x17c   :  { %1555 = vmatpush.msrb.mxu0 %v2729_v27 }
 0x17d   :  { %1388 = vmatpush.msra.mxu2 %v2731_v43  ;;  %1489 = vmatpush.msra.mxu3 %v1488_v4 }
 0x17e   :  { %1558 = vmatpush.msrb.mxu0 %v2741_v57 }
 0x17f   :  { %1618 = vmatpush.msrb.mxu2 %v1408_v13  ;;  %1495 = vmatpush.msra.mxu3 %v1494_v48  ;;  %v1500_v13 = vand.u32 4294901760, %v1499_v19 }
 0x181   :  { %1622 = vmatpush.msrb.mxu2 %v1414_v44  ;;  %1501 = vmatpush.msra.mxu3 %v1500_v13 }
 0x183   :  { %1626 = vmatpush.msrb.mxu2 %v1420_v50  ;;  %1689 = vmatpush.msrb.mxu3 %v2560_v59 }
 0x185   :  { %1630 = vmatpush.msrb.mxu2 %v1426_v0  ;;  %1691 = vmatpush.msrb.mxu3 %v2565_v31 }
 0x187   :  { %1634 = vmatpush.msrb.mxu2 %v1432_v26  ;;  %1693 = vmatpush.msrb.mxu3 %v2573_v18 }
 0x189   :  { %1638 = vmatpush.msrb.mxu2 %v1438_v10  ;;  %1695 = vmatpush.msrb.mxu3 %v2585_v46 }
 0x18b   :  { %1642 = vmatpush.msrb.mxu2 %v1444_v29  ;;  %1697 = vmatpush.msrb.mxu3 %v2599_v53 }
 0x18d   :  { %1646 = vmatpush.msrb.mxu2 %v1450_v54  ;;  %1699 = vmatpush.msrb.mxu3 %v2606_v1 }
 0x18f   :  { %1650 = vmatpush.msrb.mxu2 %v1456_v55  ;;  %1701 = vmatpush.msrb.mxu3 %v2620_v7 }
 0x191   :  { %1654 = vmatpush.msrb.mxu2 %v1462_v52  ;;  %1703 = vmatpush.msrb.mxu3 %v2629_v16 }
 0x193   :  { %1658 = vmatpush.msrb.mxu2 %v1468_v56  ;;  %1705 = vmatpush.msrb.mxu3 %v2644_v34 }
 0x195   :  { %1662 = vmatpush.msrb.mxu2 %v1474_v32  ;;  %1707 = vmatpush.msrb.mxu3 %v2657_v60 }
 0x197   :  { %1666 = vmatpush.msrb.mxu2 %v1480_v23  ;;  %1709 = vmatpush.msrb.mxu3 %v2664_v36 }
 0x199   :  { %1670 = vmatpush.msrb.mxu2 %v1486_v41  ;;  %1711 = vmatpush.msrb.mxu3 %v2678_v39 }
 0x19b   :  { %1674 = vmatpush.msrb.mxu2 %v1492_v40  ;;  %1713 = vmatpush.msrb.mxu3 %v2688_v12 }
 0x19d   :  { %1678 = vmatpush.msrb.mxu2 %v1498_v3  ;;  %1715 = vmatpush.msrb.mxu3 %v2705_v61 }
 0x19f   :  { %1717 = vmatpush.msrb.mxu3 %v2719_v24 }
 0x1a1   :  { %1719 = vmatpush.msrb.mxu3 %v2731_v43 }
 0x1b2   :  { %v2696_v47 = vpop.f32.mrf.mxu1 }
 0x1ba   :  { %v785_v20 = vpop.f32.mrf.mxu0  ;;  %v898_v22 = vpop.f32.mrf.mxu1 }
 0x1bb   :  { %v952_v50 = vpop.f32.mrf.mxu2  ;;  %v786_v51 = vadd.f32 %v1797_v17, %v785_v20 }
 0x1bc   :  { %v996_v44 = vpop.f32.mrf.mxu3 }
 0x1bd   :  { %v895_v59 = vadd.f32 %v2696_v47, %v786_v51 }
 0x1bf   :  { %v953_v46 = vadd.f32 %v952_v50, %v895_v59 }
 0x1c1   :  { %v997_v1 = vadd.f32 %v996_v44, %v953_v46 }
 0x1c2   :  { %v793_v42 = vpop.f32.mrf.mxu0  ;;  %v1112_v62 = vpop.f32.mrf.mxu1 }
 0x1c3   :  { %v794_v0 = vadd.f32 %v1797_v17, %v793_v42  ;;  %v957_v53 = vpop.f32.mrf.mxu2  ;;  %v1798_v42 = vld [vmem:[#allocation5 + $0x128] ss:$0 sm:$0xff] }
 0x1c4   :  { %v1002_v31 = vpop.f32.mrf.mxu3 }
 0x1c5   :  { %v899_v21 = vadd.f32 %v898_v22, %v794_v0 }
 0x1c7   :  { %v958_v10 = vadd.f32 %v957_v53, %v899_v21 }
 0x1c9   :  { %v1003_v34 = vadd.f32 %v1002_v31, %v958_v10 }
 0x1ca   :  { %v1071_v45 = vpop.f32.mrf.mxu0  ;;  %v1116_v2 = vpop.f32.mrf.mxu1 }
 0x1cb   :  { %v1072_v7 = vadd.f32 %v1071_v45, %v997_v1 }
 0x1cd   :  { %v1113_v29 = vadd.f32 %v1112_v62, %v1072_v7 }
 0x1d2   :  { %v1075_v18 = vpop.f32.mrf.mxu0  ;;  %v1194_v30 = vpop.f32.mrf.mxu1 }
 0x1d3   :  { %v1076_v58 = vadd.f32 %v1075_v18, %v1003_v34 }
 0x1d5   :  { %v1198_v26 = vpop.f32.mrf.mxu3  ;;  %v1117_v5 = vadd.f32 %v1116_v2, %v1076_v58 }
 0x1da   :  { %v1145_v9 = vpop.f32.mrf.mxu0  ;;  %v1328_v63 = vpop.f32.mrf.mxu1 }
 0x1db   :  { %v1146_v54 = vadd.f32 %v1145_v9, %v1113_v29 }
 0x1dd   :  { %v1153_v16 = vpop.f32.mrf.mxu2  ;;  %v1195_v60 = vadd.f32 %v1194_v30, %v1146_v54  ;;  %v1260_v55 = vpop.f32.mrf.mxu3 }
 0x1de   :  { %v1154_v52 = vadd.f32 %v1153_v16, %v1117_v5 }
 0x1e0   :  { %v1199_v32 = vadd.f32 %v1198_v26, %v1154_v52 }
 0x1e2   :  { %v1299_v39 = vpop.f32.mrf.mxu0  ;;  %v1332_v25 = vpop.f32.mrf.mxu1 }
 0x1e5   :  { %v1228_v36 = vpop.f32.mrf.mxu2  ;;  %v1266_v11 = vpop.f32.mrf.mxu3 }
 0x1e6   :  { %v1229_v28 = vadd.f32 %v1228_v36, %v1195_v60 }
 0x1e8   :  { %v1261_v56 = vadd.f32 %v1260_v55, %v1229_v28 }
 0x1ea   :  { %v1300_v47 = vadd.f32 %v1299_v39, %v1261_v56  ;;  %v1303_v8 = vpop.f32.mrf.mxu0 }
 0x1ec   :  { %v1329_v12 = vadd.f32 %v1328_v63, %v1300_v47 }
 0x1ed   :  { %v1233_v38 = vpop.f32.mrf.mxu2 }
 0x1ee   :  { %v1335_v14 = vmul.f32 0.01, %v1329_v12  ;;  %v1234_v61 = vadd.f32 %v1233_v38, %v1199_v32 }
 0x1f0   :  { %v1337_v15 = vmax.f32 %v1329_v12, %v1335_v14  ;;  %v1267_v23 = vadd.f32 %v1266_v11, %v1234_v61 }
 0x1f2   :  { %v1304_v20 = vadd.f32 %v1303_v8, %v1267_v23  ;;  %v1389_v24 = vand.u32 4294901760, %v1337_v15 }
 0x1f4   :  { %v1333_v35 = vadd.f32 %v1332_v25, %v1304_v20  ;;  %1503 = vmatmul.f32.vlgmr.msra.gmra.mxu3 %v1389_v24  ;;  %v1390_v37 = vsub.f32 %v1337_v15, %v1389_v24 }
 0x1f6   :  { %v1336_v41 = vmul.f32 0.01, %v1333_v35  ;;  %1561 = vmatmul.f32.vlgmr.msrb.gmra.mxu0 %v1390_v37  ;;  %v1391_v27 = vand.u32 4294901760, %v1390_v37 }
 0x1f8   :  { %v1338_v43 = vmax.f32 %v1333_v35, %v1336_v41  ;;  %1605 = vmatmul.f32.vlgmr.msrb.gmra.mxu1 %v1391_v27  ;;  %v1392_v49 = vsub.f32 %v1390_v37, %v1391_v27 }
 0x1fa   :  { %v1393_v6 = vand.u32 4294901760, %v1392_v49  ;;  %v1397_v40 = vand.u32 4294901760, %v1338_v43 }
 0x1fc   :  { %1394 = vmatmul.f32.vlgmr.msra.gmra.mxu2 %v1393_v6  ;;  %1507 = vmatmul.f32.gmra.mxu3 %v1397_v40  ;;  %v1398_v57 = vsub.f32 %v1338_v43, %v1397_v40 }
 0x1fe   :  { %1566 = vmatmul.f32.gmra.mxu0 %v1398_v57  ;;  %v1399_v4 = vand.u32 4294901760, %v1398_v57 }
 0x200   :  { %1611 = vmatmul.f32.gmra.mxu1 %v1399_v4  ;;  %v1400_v33 = vsub.f32 %v1398_v57, %v1399_v4 }
 0x202   :  { %v1401_v3 = vand.u32 4294901760, %v1400_v33 }
 0x204   :  { %1402 = vmatmul.f32.gmra.mxu2 %v1401_v3  ;;  %1721 = vmatmul.f32.vlgmr.msrb.gmra.mxu3 %v1389_v24 }
 0x20c   :  { %1680 = vmatmul.f32.vlgmr.msrb.gmra.mxu2 %v1389_v24  ;;  %1725 = vmatmul.f32.gmra.mxu3 %v1397_v40 }
 0x214   :  { %1684 = vmatmul.f32.gmra.mxu2 %v1397_v40 }
 0x273   :  { %v1562_v44 = vpop.f32.mrf.mxu0 }
 0x275   :  { %v1606_v51 = vpop.f32.mrf.mxu1 }
 0x277   :  { %v1504_v22 = vpop.f32.mrf.mxu3 }
 0x27b   :  { %v1567_v53 = vpop.f32.mrf.mxu0 }
 0x27d   :  { %v1612_v21 = vpop.f32.mrf.mxu1 }
 0x27f   :  { %v1395_v48 = vpop.f32.mrf.mxu2  ;;  %v1508_v13 = vpop.f32.mrf.mxu3 }
 0x280   :  { %v1396_v19 = vadd.f32 %v1798_v42, %v1395_v48 }
 0x282   :  { %v1505_v17 = vadd.f32 %v1504_v22, %v1396_v19 }
 0x284   :  { %v1563_v62 = vadd.f32 %v1562_v44, %v1505_v17 }
 0x286   :  { %v1607_v31 = vadd.f32 %v1606_v51, %v1563_v62 }
 0x287   :  { %v1403_v45 = vpop.f32.mrf.mxu2  ;;  %v1722_v18 = vpop.f32.mrf.mxu3 }
 0x288   :  { %v1404_v50 = vadd.f32 %v1798_v42, %v1403_v45 }
 0x28a   :  { %v1509_v59 = vadd.f32 %v1508_v13, %v1404_v50 }
 0x28c   :  { %v1568_v1 = vadd.f32 %v1567_v53, %v1509_v59 }
 0x28e   :  { %v1613_v7 = vadd.f32 %v1612_v21, %v1568_v1 }
 0x28f   :  { %v1681_v46 = vpop.f32.mrf.mxu2  ;;  %v1726_v9 = vpop.f32.mrf.mxu3 }
 0x290   :  { %v1682_v0 = vadd.f32 %v1681_v46, %v1607_v31 }
 0x292   :  { %v1723_v2 = vadd.f32 %v1722_v18, %v1682_v0 }
 0x294   :  { %1729 = vst [vmem:[#allocation7] sm:$0xff] %v1723_v2 }
 0x297   :  { %v1685_v26 = vpop.f32.mrf.mxu2 }
 0x298   :  { %v1686_v10 = vadd.f32 %v1685_v26, %v1613_v7 }
 0x29a   :  { %v1727_v16 = vadd.f32 %v1726_v9, %v1686_v10 }
 0x29c   :  { %1730 = vst [vmem:[#allocation7 + $0x8] sm:$0xf] %v1727_v16 }
 0x29d   :  { %1743 = dma.vmem_to_hbm [thread:$0]  %s1736_s28, 256, %s1738_s4, [#allocation4], %s1881_s24, %s1881_s24, %s1882_s25  }
 0x29e   :  { %1875 = dma.done.wait [#allocation4], 256  }
 0x29f   :  { %1876 = vsyncadd [#allocation4], 4294967040 }
 0x2a0   :  { %1748 = vsyncpa [#allocation3], 1 }
 0x2a1   :  { %1749 = vsyncpa [#allocation6], 1 }
 0x2a2   :  { %1750 = vsyncpa [#allocation4], 1 }

</bundles_post_ra>
